<compile_context>
chip_gen: v7x
topology: tpu7x:2x2x1
jax: 0.10.0
libtpu: 0.0.40
codegen_flags: <defaults>
</compile_context>

<pallas_src>
import math

import jax
import jax.numpy as jnp
from jax.experimental import pallas as pl
from jax.experimental.pallas import tpu as pltpu


def _gelu_tanh(x):
    # GELU with tanh approximation (matches nn.GELU(approximate='tanh')).
    c = math.sqrt(2.0 / math.pi)
    return 0.5 * x * (1.0 + jnp.tanh(c * (x + 0.044715 * x * x * x)))


def mlp_kernel(x_ref, wfc_ref, bfc_ref, wproj_ref, bproj_ref, o_ref, acc_ref):
    # x_ref:     (tm, C)   tile of tokens (rows = tokens, lanes = embed)
    # wfc_ref:   (C, th)   hidden-tile of the first weight
    # bfc_ref:   (1, th)   hidden-tile of the first bias
    # wproj_ref: (th, C)   hidden-tile of the second weight
    # bproj_ref: (1, C)    second bias (added once in epilogue)
    # o_ref:     (tm, C)   output tile (resident across the H axis)
    # acc_ref:   (tm, C)   f32 accumulator scratch
    h_idx = pl.program_id(1)

    @pl.when(h_idx == 0)
    def _init():
        acc_ref[...] = jnp.zeros_like(acc_ref)

    # First matmul on the MXU: native-dtype inputs, f32 accumulation.
    h = jnp.dot(x_ref[...], wfc_ref[...], preferred_element_type=jnp.float32)
    h = h + bfc_ref[...].astype(jnp.float32)

    # tanh-approx GELU in f32 (VPU + EUP, overlaps under the MXU).
    g = _gelu_tanh(h)

    # Second matmul partial product over this hidden tile; accumulate in f32.
    acc_ref[...] += jnp.dot(g.astype(wproj_ref.dtype), wproj_ref[...],
                            preferred_element_type=jnp.float32)

    # Epilogue: add the output bias once and write the tile.
    @pl.when(h_idx == pl.num_programs(1) - 1)
    def _finalize():
        o_ref[...] = (acc_ref[...]
                      + bproj_ref[...].astype(jnp.float32)).astype(o_ref.dtype)


def mlp_pallas(x, w_fc, b_fc, w_proj, b_proj, *, tm=256, th=512):
    """x: (B, T, C). w_fc: (C, H), b_fc: (H,), w_proj: (H, C), b_proj: (C,).

    Weights are stored pre-transposed as (in_features, out_features) so the
    kernel does plain row-major matmuls. Works for float32 or bfloat16 inputs.
    """
    B, T, C = x.shape
    Cw, H = w_fc.shape
    assert Cw == C and w_proj.shape == (H, C)
    assert b_fc.shape == (H,) and b_proj.shape == (C,)
    # Lane-dense shapes: embed and hidden dims must be multiples of 128.
    assert C % 128 == 0 and H % 128 == 0, "C and H must be multiples of 128"

    M = B * T
    tm = min(tm, M)
    th = min(th, H)
    assert M % tm == 0, f"M={M} must be divisible by tm={tm}"
    assert H % th == 0, f"H={H} must be divisible by th={th}"

    x2d = x.reshape(M, C)
    b_fc2 = b_fc.reshape(1, H)
    b_proj2 = b_proj.reshape(1, C)

    itemsize = x.dtype.itemsize
    w_itemsize = w_fc.dtype.itemsize
    cost = pl.CostEstimate(
        flops=4 * M * C * H,                       # two (M,C,H) matmuls
        transcendentals=M * H,                     # one tanh per hidden act
        bytes_accessed=(x2d.size + M * C) * itemsize
        + (M // tm) * (w_fc.size + w_proj.size) * w_itemsize
        + (b_fc2.size + b_proj2.size) * b_fc.dtype.itemsize,
    )

    out2d = pl.pallas_call(
        mlp_kernel,
        out_shape=jax.ShapeDtypeStruct((M, C), x.dtype),
        grid_spec=pltpu.PrefetchScalarGridSpec(
            num_scalar_prefetch=0,
            grid=(M // tm, H // th),               # reduction axis (H) last
            in_specs=[
                pl.BlockSpec((tm, C), lambda i, h: (i, 0)),   # x tile
                pl.BlockSpec((C, th), lambda i, h: (0, h)),   # W_fc hidden tile
                pl.BlockSpec((1, th), lambda i, h: (0, h)),   # b_fc hidden tile
                pl.BlockSpec((th, C), lambda i, h: (h, 0)),   # W_proj hidden tile
                pl.BlockSpec((1, C), lambda i, h: (0, 0)),    # b_proj
            ],
            out_specs=pl.BlockSpec((tm, C), lambda i, h: (i, 0)),
            scratch_shapes=[pltpu.VMEM((tm, C), jnp.float32)],
        ),
        compiler_params=pltpu.CompilerParams(
            dimension_semantics=("parallel", "arbitrary")),
        cost_estimate=cost,
    )(x2d, w_fc, b_fc2, w_proj, b_proj2)

    return out2d.reshape(B, T, C)


def mlp_reference(x, w_fc, b_fc, w_proj, b_proj):
    h = jnp.einsum("btc,ch->bth", x.astype(jnp.float32),
                   w_fc.astype(jnp.float32)) + b_fc.astype(jnp.float32)
    h = _gelu_tanh(h)
    return (jnp.einsum("bth,hc->btc", h, w_proj.astype(jnp.float32))
            + b_proj.astype(jnp.float32))


if __name__ == "__main__":
    # Small but lane-aligned config: n_embd = 128, hidden = 4*128 = 512,
    # B = 2, T = 128  ->  M = 256 token rows.
    B, T, C = 2, 128, 128
    H = 4 * C

    key = jax.random.PRNGKey(0)
    kx, k1, k2, k3, k4 = jax.random.split(key, 5)

    x = jax.random.normal(kx, (B, T, C), dtype=jnp.float32)

    # GPT-style init: normal(0, 0.02) weights, zero biases (small perturbation
    # added to biases so the bias path is actually exercised).
    w_fc = 0.02 * jax.random.normal(k1, (C, H), dtype=jnp.float32)
    b_fc = 0.02 * jax.random.normal(k2, (H,), dtype=jnp.float32)
    w_proj = 0.02 * jax.random.normal(k3, (H, C), dtype=jnp.float32)
    b_proj = 0.02 * jax.random.normal(k4, (C,), dtype=jnp.float32)

    # f32 run: tm=128, th=256 exercises both grid axes (2 x 2 grid).
    out = mlp_pallas(x, w_fc, b_fc, w_proj, b_proj, tm=128, th=256)
    out = jax.block_until_ready(out)

    ref = mlp_reference(x, w_fc, b_fc, w_proj, b_proj)
    assert out.shape == (B, T, C)
    assert jnp.allclose(out, ref, atol=2e-5, rtol=2e-5), "f32 mismatch vs reference"

    # bf16 run: native bf16 matmul inputs, f32 MXU accumulation + f32 GELU.
    out_bf16 = mlp_pallas(x.astype(jnp.bfloat16),
                          w_fc.astype(jnp.bfloat16), b_fc.astype(jnp.bfloat16),
                          w_proj.astype(jnp.bfloat16), b_proj.astype(jnp.bfloat16),
                          tm=128, th=256)
    out_bf16 = jax.block_until_ready(out_bf16)
    assert out_bf16.shape == (B, T, C)
    assert jnp.allclose(out_bf16.astype(jnp.float32), ref, atol=5e-2, rtol=5e-2), \
        "bf16 mismatch vs reference"

    print("KERNEL_OK")
</pallas_src>

<mosaic_0001>
module attributes {stable_mosaic.version = 11 : i64} {
  func.func @mlp_kernel(%arg0: i32, %arg1: i32, %arg2: memref<128x128xf32, #tpu.memory_space<vmem>>, %arg3: memref<128x256xf32, #tpu.memory_space<vmem>>, %arg4: memref<1x256xf32, #tpu.memory_space<vmem>>, %arg5: memref<256x128xf32, #tpu.memory_space<vmem>>, %arg6: memref<1x128xf32, #tpu.memory_space<vmem>>, %arg7: memref<128x128xf32, #tpu.memory_space<vmem>>, %arg8: memref<128x128xf32, #tpu.memory_space<vmem>>) attributes {dimension_semantics = [#tpu.dimension_semantics<parallel>, #tpu.dimension_semantics<arbitrary>], iteration_bounds = array<i64: 2, 2>, scalar_prefetch = 0 : i64, scratch_operands = 1 : i64, tpu.core_type = #tpu.core_type<tc>, window_params = [{transform_indices = @transform_0, window_bounds = array<i64: 128, 128>}, {transform_indices = @transform_1, window_bounds = array<i64: 128, 256>}, {transform_indices = @transform_2, window_bounds = array<i64: 1, 256>}, {transform_indices = @transform_3, window_bounds = array<i64: 256, 128>}, {pipeline_mode = #tpu.pipeline_mode<synchronous>, transform_indices = @transform_4, window_bounds = array<i64: 1, 128>}, {transform_indices = @transform_5, window_bounds = array<i64: 128, 128>}]} {
    %c0_i32 = arith.constant 0 : i32
    %0 = arith.cmpi eq, %arg1, %c0_i32 : i32
    %1 = arith.extui %0 : i1 to i32
    %c0_i32_0 = arith.constant 0 : i32
    %2 = arith.cmpi ne, %1, %c0_i32_0 : i32
    scf.if %2 {
      %cst_18 = arith.constant 0.000000e+00 : f32
      %30 = vector.broadcast %cst_18 : f32 to vector<128x128xf32>
      %c0_19 = arith.constant 0 : index
      %c0_20 = arith.constant 0 : index
      %31 = vector.load %arg8[%c0_19, %c0_20] : memref<128x128xf32, #tpu.memory_space<vmem>>, vector<128x128xf32>
      tpu.vector_store %arg8[%c0_19, %c0_20], %30 {strides = array<i32>} : memref<128x128xf32, #tpu.memory_space<vmem>>, vector<128x128xf32>,
    } else {
    }
    %c0 = arith.constant 0 : index
    %c0_1 = arith.constant 0 : index
    %3 = vector.load %arg2[%c0, %c0_1] : memref<128x128xf32, #tpu.memory_space<vmem>>, vector<128x128xf32>
    %c0_2 = arith.constant 0 : index
    %c0_3 = arith.constant 0 : index
    %4 = vector.load %arg3[%c0_2, %c0_3] : memref<128x256xf32, #tpu.memory_space<vmem>>, vector<128x256xf32>
    %cst = arith.constant dense<0.000000e+00> : vector<128x256xf32>
    %5 = tpu.matmul %3, %4, %cst {dimension_numbers = #tpu.dot_dimension_numbers<[1], [0], [0], [1], [0, 0, 1, 1], [], []>} : vector<128x128xf32>, vector<128x256xf32>, vector<128x256xf32> -> vector<128x256xf32>
    %c0_4 = arith.constant 0 : index
    %c0_5 = arith.constant 0 : index
    %6 = vector.load %arg4[%c0_4, %c0_5] : memref<1x256xf32, #tpu.memory_space<vmem>>, vector<1x256xf32>
    %7 = vector.broadcast %6 : vector<1x256xf32> to vector<128x256xf32>
    %8 = arith.addf %5, %7 : vector<128x256xf32>
    %cst_6 = arith.constant 5.000000e-01 : f32
    %9 = vector.broadcast %cst_6 : f32 to vector<128x256xf32>
    %10 = arith.mulf %9, %8 : vector<128x256xf32>
    %cst_7 = arith.constant 4.471500e-02 : f32
    %11 = vector.broadcast %cst_7 : f32 to vector<128x256xf32>
    %12 = arith.mulf %11, %8 : vector<128x256xf32>
    %13 = arith.mulf %12, %8 : vector<128x256xf32>
    %14 = arith.mulf %13, %8 : vector<128x256xf32>
    %15 = arith.addf %8, %14 : vector<128x256xf32>
    %cst_8 = arith.constant 0.797884583 : f32
    %16 = vector.broadcast %cst_8 : f32 to vector<128x256xf32>
    %17 = arith.mulf %16, %15 : vector<128x256xf32>
    %18 = math.tanh %17 : vector<128x256xf32>
    %cst_9 = arith.constant 1.000000e+00 : f32
    %19 = vector.broadcast %cst_9 : f32 to vector<128x256xf32>
    %20 = arith.addf %19, %18 : vector<128x256xf32>
    %21 = arith.mulf %10, %20 : vector<128x256xf32>
    %c0_10 = arith.constant 0 : index
    %c0_11 = arith.constant 0 : index
    %22 = vector.load %arg8[%c0_10, %c0_11] : memref<128x128xf32, #tpu.memory_space<vmem>>, vector<128x128xf32>
    %c0_12 = arith.constant 0 : index
    %c0_13 = arith.constant 0 : index
    %23 = vector.load %arg5[%c0_12, %c0_13] : memref<256x128xf32, #tpu.memory_space<vmem>>, vector<256x128xf32>
    %cst_14 = arith.constant dense<0.000000e+00> : vector<128x128xf32>
    %24 = tpu.matmul %21, %23, %cst_14 {dimension_numbers = #tpu.dot_dimension_numbers<[1], [0], [0], [1], [0, 0, 1, 1], [], []>} : vector<128x256xf32>, vector<256x128xf32>, vector<128x128xf32> -> vector<128x128xf32>
    %25 = arith.addf %22, %24 : vector<128x128xf32>
    %c0_15 = arith.constant 0 : index
    %c0_16 = arith.constant 0 : index
    %26 = vector.load %arg8[%c0_15, %c0_16] : memref<128x128xf32, #tpu.memory_space<vmem>>, vector<128x128xf32>
    tpu.vector_store %arg8[%c0_15, %c0_16], %25 {strides = array<i32>} : memref<128x128xf32, #tpu.memory_space<vmem>>, vector<128x128xf32>,
    %c1_i32 = arith.constant 1 : i32
    %27 = arith.cmpi eq, %arg1, %c1_i32 : i32
    %28 = arith.extui %27 : i1 to i32
    %c0_i32_17 = arith.constant 0 : i32
    %29 = arith.cmpi ne, %28, %c0_i32_17 : i32
    scf.if %29 {
      %c0_18 = arith.constant 0 : index
      %c0_19 = arith.constant 0 : index
      %30 = vector.load %arg8[%c0_18, %c0_19] : memref<128x128xf32, #tpu.memory_space<vmem>>, vector<128x128xf32>
      %c0_20 = arith.constant 0 : index
      %c0_21 = arith.constant 0 : index
      %31 = vector.load %arg6[%c0_20, %c0_21] : memref<1x128xf32, #tpu.memory_space<vmem>>, vector<1x128xf32>
      %32 = vector.broadcast %31 : vector<1x128xf32> to vector<128x128xf32>
      %33 = arith.addf %30, %32 : vector<128x128xf32>
      %c0_22 = arith.constant 0 : index
      %c0_23 = arith.constant 0 : index
      %34 = vector.load %arg7[%c0_22, %c0_23] : memref<128x128xf32, #tpu.memory_space<vmem>>, vector<128x128xf32>
      tpu.vector_store %arg7[%c0_22, %c0_23], %33 {strides = array<i32>} : memref<128x128xf32, #tpu.memory_space<vmem>>, vector<128x128xf32>,
    } else {
    }
    return
  }
  func.func @transform_0(%arg0: i32, %arg1: i32) -> (i32, i32) {
    %c0_i32 = arith.constant 0 : i32
    %c0_i32_0 = arith.constant 0 : i32
    return %arg0, %c0_i32 : i32, i32
  }
  func.func @transform_1(%arg0: i32, %arg1: i32) -> (i32, i32) {
    %c0_i32 = arith.constant 0 : i32
    %c0_i32_0 = arith.constant 0 : i32
    return %c0_i32, %arg1 : i32, i32
  }
  func.func @transform_2(%arg0: i32, %arg1: i32) -> (i32, i32) {
    %c0_i32 = arith.constant 0 : i32
    %c0_i32_0 = arith.constant 0 : i32
    return %c0_i32, %arg1 : i32, i32
  }
  func.func @transform_3(%arg0: i32, %arg1: i32) -> (i32, i32) {
    %c0_i32 = arith.constant 0 : i32
    %c0_i32_0 = arith.constant 0 : i32
    return %arg1, %c0_i32 : i32, i32
  }
  func.func @transform_4(%arg0: i32, %arg1: i32) -> (i32, i32) {
    %c0_i32 = arith.constant 0 : i32
    %c0_i32_0 = arith.constant 0 : i32
    %c0_i32_1 = arith.constant 0 : i32
    return %c0_i32, %c0_i32_0 : i32, i32
  }
  func.func @transform_5(%arg0: i32, %arg1: i32) -> (i32, i32) {
    %c0_i32 = arith.constant 0 : i32
    %c0_i32_0 = arith.constant 0 : i32
    return %arg0, %c0_i32 : i32, i32
  }
}

</mosaic_0001>

<bundles_post_ra>
// kernel: tpu_custom_call.1
= control target key start
LH: loop header
LB: loop body
LE: loop exit
PB: predicated region body
PF: predicated region fallthrough
CT: control target
= control target key end

     0   :  { %s2691_s0 = inlined_call_operand.hbm [shape: f32[256,128], index: 0, kind: input, shape index: {}]   ;;  %s2692_s1 = inlined_call_operand.hbm [shape: f32[128,512], index: 1, kind: input, shape index: {}]   ;;  %s2693_s2 = inlined_call_operand.vmem [shape: f32[1,512], index: 2, kind: input, shape index: {}]   ;;  %s2694_s3 = inlined_call_operand.hbm [shape: f32[512,128], index: 3, kind: input, shape index: {}]   ;;  %s2695_s4 = inlined_call_operand.vmem [shape: f32[1,128], index: 4, kind: input, shape index: {}]   ;;  %s2696_s5 = inlined_call_operand.hbm [shape: f32[256,128], index: 5, kind: output, shape index: {}]  }
   0x1   :  { %2709 = sst [smem:[#allocation21_spill]] %s2692_s1 }
   0x2   :  { %2710 = sst [smem:[#allocation22_spill]] %s2695_s4 }
   0x3   :  { %2711 = sst [smem:[#allocation23_spill]] %s2696_s5 }
   0x4   :  { %10 = vsyncpa [#allocation4], 0 }
   0x5   :  { %12 = vsyncpa [#allocation4 + $0x1], 0 }
   0x6   :  { %13 = vsyncpa [#allocation7], 0 }
   0x7   :  { %15 = vsyncpa [#allocation7 + $0x1], 0 }
   0x8   :  { %16 = vsyncpa [#allocation5], 0 }
   0x9   :  { %18 = vsyncpa [#allocation5 + $0x1], 0  ;;  %s1939_s18 = smov 0   ;;  %s1941_s19 = smov 0  }
   0xa   :  { %s1943_s20 = smov 0   ;;  %s1945_s21 = smov 0  }
   0xb   :  { %s1947_s22 = smov 0   ;;  %s1949_s23 = smov 0  }
   0xc   :  { %s1951_s24 = smov 0   ;;  %s1953_s25 = smov 0  }
   0xd   :  { %s1955_s26 = smov 0   ;;  %s1957_s27 = smov 0  }
   0xe   :  { %s1959_s28 = smov 0  }
   0xf LB: > { %2712 = sst [smem:[#allocation13_spill]] %s1862_s20  ;;  %s33_s29 = sadd.s32 1, %s1886_s26  ;;  %s1894_s28 = sphi %s1959_s28, %s24_s28   ;;  %s1890_s27 = sphi %s1957_s27, %s2750_s27   ;;  %s1886_s26 = sphi %s1955_s26, %s2756_s26   ;;  %s1882_s25 = sphi %s1953_s25, %s2748_s25   ;;  %s1878_s24 = sphi %s1951_s24, %s2755_s24   ;;  %s1874_s23 = sphi %s1949_s23, %s2747_s23   ;;  %s1870_s22 = sphi %s1947_s22, %s2754_s22   ;;  %s1866_s21 = sphi %s1945_s21, %s2753_s21   ;;  %s1862_s20 = sphi %s1943_s20, %s2745_s20   ;;  %s1858_s19 = sphi %s1941_s19, %s2752_s19   ;;  %s1854_s18 = sphi %s1939_s18, %s2751_s18  }
  0x10   : > { %2713 = sst [smem:[#allocation14_spill]] %s1874_s23  ;;  %p2699_p0 = scmp.eq.s32.totalorder %s1894_s28, 0 }
  0x11   : > { %2714 = sst [smem:[#allocation15_spill]] %s1882_s25  ;;  %p1996_p1 = scmp.ge.s32.totalorder %s33_s29, 2 }
  0x12   : > { %2715 = sst [smem:[#allocation16_spill]] %s1890_s27  ;;  %s69_s6 = sadd.s32 1, %s1862_s20 }
  0x13   : > { %p76_p2 = scmp.ne.s32.totalorder %s1862_s20, %s1858_s19  ;;  %s2758_s29 = smov (%p1996_p1, %s33_s29), 0 }
  0x14   : > { %2717 = sst [smem:[#allocation17_spill]] %s2758_s29  ;;  %s66_s7 = ssub.s32 %s1886_s26, %s2758_s29 }
  0x15   : > { %p78_p4 = por %p76_p2, %p2699_p0  ;;  %p2698_p5 = scmp.lt.s32.totalorder %s1894_s28, 4 }
  0x16   : > { %p67_p6 = scmp.eq.s32.totalorder %s66_s7, 0  ;;  %s229_s8 = sand.u32 1, %s1894_s28  }
  0x17   : > { %s231_s9 = sand.u32 1, %s1862_s20   ;;  %s1346_s12 = sshll.u32 %s1886_s26, 8 }
  0x18   : > { %s2017_s10 = scalar_select %p67_p6, %s1862_s20, %s69_s6  }
  0x19   : > { %s2019_s11 = sshll.u32 %s231_s9, 8  ;;  %s2719_s1 = sld [smem:[#allocation21_spill]] }
  0x1a   : > { %2718 = sst [smem:[#allocation18_spill]] %s2017_s10  ;;  %s233_s16 = scalar_lea.vmem [#allocation6], %s2019_s11 }
  0x1b   : > { %s240_s17 = sshll.u32 %s233_s16, 4  ;;  %p2030_p7 = pnand %p2698_p5, %p78_p4  ;;  %s2034_s17 = int_to_ptr.vmem [resolvable:$true] %s240_s17 }
  0x1c   : > { %s2037_s6 = scalar_lea.sflag [#allocation7], %s229_s8 }
  0x1d   : > { %p2700_p10 = pneg %p2030_p7 }
  0x1f   : > { %s2025_s15 = scalar_lea.hbm %s2719_s1, %s1346_s12  ;;  %s1683_s14 = scalar_lea.hbm %s2719_s1, 8192 }
  0x20   : > { %s1678_s9 = scalar_lea.hbm %s2025_s15, 4096  ;;  %p1684_p13 = scmp.lt.u32.totalorder %s2025_s15, %s2719_s1 }
  0x21   : > { %p1679_p9 = scmp.ne.s32.totalorder %s2025_s15, %s1678_s9  ;;  %p1685_p2 = scmp.lt.u32.totalorder %s1683_s14, %s1678_s9 }
  0x22   : > { %p1687_p6 = scmp.lt.u32.totalorder %s1678_s9, %s2025_s15 }
  0x23   : > { %p1681_p11 = pnand %p2700_p10, %p1679_p9  ;;  %p1686_p4 = por %p1685_p2, %p1684_p13 }
  0x25   : > { %p1682_p12 = pneg %p1681_p11  ;;  %p1688_p5 = por %p1687_p6, %p1686_p4 }
  0x27   : > { %p1689_p3 = pnand %p1688_p5, %p1682_p12 }
  0x29   : > { %1692 = shalt.err (!%p1689_p3)
}
  0x2a   : > { %s1693_s8 = scalar_lea.vmem %s2034_s17, 4096  ;;  %s1896_s12 = smov [#allocation6]  }
  0x2b   : > { %p1694_p9 = scmp.ne.s32.totalorder %s2034_s17, %s1693_s8  ;;  %s1698_s13 = sshll.u32 %s1896_s12, 4  ;;  %s1699_s13 = int_to_ptr.vmem [resolvable:$false] %s1698_s13 }
  0x2c   : > { %s1700_s29 = scalar_lea.vmem %s1699_s13, 8192  ;;  %p1701_p8 = scmp.lt.s32.totalorder %s2034_s17, %s1699_s13 }
  0x2d   : > { %p1696_p11 = pnand %p1694_p9, %p2700_p10  ;;  %p1702_p13 = scmp.lt.s32.totalorder %s1700_s29, %s1693_s8 }
  0x2f   : > { %p1697_p0 = pneg %p1696_p11  ;;  %p1703_p2 = por %p1702_p13, %p1701_p8 }
  0x31   : > { %p1704_p4 = pnand %p1703_p2, %p1697_p0 }
  0x33   : > { %1707 = shalt.err (!%p1704_p4)
}
  0x34   : > { %s1897_s9 = smov 512   ;;  %s1898_s14 = smov 256  }
  0x35   : > { %s1899_s16 = smov 16   ;;  %p277_p0 = scmp.lt.s32.totalorder %s1894_s28, 5 }
  0x36   : > { %1507 = dma.hbm_to_vmem [thread:$0]  (!%p2030_p7), %s2025_s15, 4096, %s2034_s17, %s2037_s6, %s1897_s9, %s1898_s14, %s1899_s16  }
  0x37   : > { %p2721_p3 = scmp.ge.s32.totalorder %s1894_s28, 1  ;;  %s2073_s12 = sadd.s32 4294967295, %s1894_s28  }
  0x38   : > { %s1319_s13 = sadd.s32 4294967294, %s1894_s28   ;;  %s36_s29 = sadd.s32 1, %s1890_s27 }
  0x39   : > { %p2068_p5 = pnand %p2721_p3, %p277_p0  ;;  %s43_s1 = sadd.s32 1, %s1874_s23 }
  0x3a   : > { %s2760_s29 = smov (!%p1996_p1, %s36_s29), %s1890_s27  ;;  %p50_p8 = scmp.ne.s32.totalorder %s1874_s23, %s1870_s22 }
  0x3b   : > { %s2722_s8 = scalar_select %p2068_p5, 1, 0 }
  0x3c   : > { %p56_p12 = scmp.ne.s32.totalorder %s1870_s22, %s1866_s21  ;;  %p38_p6 = scmp.ge.s32.totalorder %s2760_s29, 2 }
  0x3d   : > { %p57_p9 = scmp.eq.s32.totalorder %s2073_s12, 0  ;;  %p2723_p11 = scmp.eq.s32.totalorder %s1894_s28, 0 }
  0x3e   : > { %p179_p2 = scmp.eq.s32.totalorder %s2073_s12, 3  ;;  %s2762_s29 = smov (%p38_p6, %s2760_s29), 0 }
  0x3f   : > { %p2088_p13 = por %p2723_p11, %p50_p8  ;;  %2725 = sst [smem:[#allocation19_spill]] %s2762_s29 }
  0x40   : > { %p2098_p1 = por %p57_p9, %p56_p12  ;;  %p2727_p4 = scmp.ne.s32.totalorder %s1858_s19, %s1854_s18 }
  0x41   : > { %s40_s9 = ssub.s32 %s1890_s27, %s2762_s29  ;;  %p2111_p3 = por %p179_p2, %p50_p8 }
  0x42   : > { %s2726_s30 = scalar_select %p2098_p1, 1, 0 }
  0x43   : > { %p2105_p0 = por %p2727_p4, %p57_p9  ;;  %p41_p11 = scmp.eq.s32.totalorder %s40_s9, 0 }
  0x44   : > { %s2729_s14 = scalar_select %p2111_p3, 1, 0 }
  0x45   : > { %s2728_s17 = scalar_select %p2105_p0, 1, 0 }
  0x46   : > { %p185_p10 = scmp.eq.s32.totalorder %s1319_s13, 3  ;;  %s208_s16 = sand.u32 1, %s1874_s23  }
  0x47   : > { %s1345_s10 = sshll.u32 %s1890_s27, 11  ;;  %s1322_s18 = sshll.u32 %s208_s16, 7 }
  0x48   : > { %s2118_s20 = scalar_select %p41_p11, %s1874_s23, %s43_s1  }
  0x49   : > { %p2123_p6 = por %p185_p10, %p56_p12  ;;  %s2130_s29 = scalar_lea.hbm %s2691_s0, %s1345_s10 }
  0x4a   : > { %2730 = sst [smem:[#allocation20_spill]] %s2118_s20  ;;  %p2732_p8 = scmp.lt.s32.totalorder %s1894_s28, 4 }
  0x4b   : > { %s2731_s5 = scalar_select %p2123_p6, 1, 0 }
  0x4c   : > { %p2136_p9 = pnand %p2732_p8, %p2088_p13  ;;  %s212_s13 = scalar_lea.vmem [#allocation3], %s1322_s18 }
  0x4d   : > { %s219_s9 = sshll.u32 %s212_s13, 4  ;;  %s2142_s27 = scalar_lea.sflag [#allocation4], %s208_s16  ;;  %s2140_s9 = int_to_ptr.vmem [resolvable:$true] %s219_s9 }
  0x4e   : > { %s1708_s4 = scalar_lea.hbm %s2130_s29, 2048  ;;  %p1710_p12 = pneg %p2136_p9 }
  0x4f   : > { %p1709_p10 = scmp.ne.s32.totalorder %s2130_s29, %s1708_s4  ;;  %s1713_s15 = scalar_lea.hbm %s2691_s0, 4096 }
  0x50   : > { %p1714_p13 = scmp.lt.u32.totalorder %s2130_s29, %s2691_s0  ;;  %p1715_p11 = scmp.lt.u32.totalorder %s1713_s15, %s1708_s4 }
  0x51   : > { %p1711_p2 = pnand %p1710_p12, %p1709_p10  ;;  %p1717_p6 = scmp.lt.u32.totalorder %s1708_s4, %s2130_s29 }
  0x52   : > { %p1716_p8 = por %p1715_p11, %p1714_p13 }
  0x53   : > { %p1712_p4 = pneg %p1711_p2 }
  0x54   : > { %p1718_p3 = por %p1717_p6, %p1716_p8 }
  0x56   : > { %p1719_p0 = pnand %p1718_p3, %p1712_p4 }
  0x58   : > { %1722 = shalt.err (!%p1719_p0)
}
  0x59   : > { %s1723_s16 = scalar_lea.vmem %s2140_s9, 2048  ;;  %s1900_s18 = smov [#allocation3]  }
  0x5a   : > { %p1724_p10 = scmp.ne.s32.totalorder %s2140_s9, %s1723_s16  ;;  %s1728_s13 = sshll.u32 %s1900_s18, 4  ;;  %s1729_s13 = int_to_ptr.vmem [resolvable:$false] %s1728_s13 }
  0x5b   : > { %s1730_s20 = scalar_lea.vmem %s1729_s13, 4096  ;;  %p1731_p5 = scmp.lt.s32.totalorder %s2140_s9, %s1729_s13 }
  0x5c   : > { %p1726_p2 = pnand %p1724_p10, %p1710_p12  ;;  %p1732_p13 = scmp.lt.s32.totalorder %s1730_s20, %s1723_s16 }
  0x5e   : > { %p1727_p1 = pneg %p1726_p2  ;;  %p1733_p11 = por %p1732_p13, %p1731_p5 }
  0x60   : > { %p1734_p6 = pnand %p1733_p11, %p1727_p1 }
  0x62   : > { %1737 = shalt.err (!%p1734_p6)
}
  0x63   : > { %s1901_s23 = smov 128   ;;  %s1902_s4 = smov 8  }
  0x64   : > { %1504 = dma.hbm_to_vmem [thread:$0]  (!%p2136_p9), %s2130_s29, 2048, %s2140_s9, %s2142_s27, %s1901_s23, %s1901_s23, %s1902_s4  }
  0x65   : > { %s1347_s25 = sshll.u32 %s1886_s26, 12  ;;  %s262_s10 = scalar_lea.vmem [#allocation8], %s2019_s11 }
  0x66   : > { %s269_s15 = sshll.u32 %s262_s10, 4  ;;  %s2178_s13 = scalar_lea.hbm %s2694_s3, %s1347_s25  ;;  %s2180_s15 = int_to_ptr.vmem [resolvable:$true] %s269_s15 }
  0x67   : > { %s1738_s20 = scalar_lea.hbm %s2178_s13, 4096  ;;  %p2734_p1 = pneg %p2030_p7 }
  0x68   : > { %p1739_p5 = scmp.ne.s32.totalorder %s2178_s13, %s1738_s20  ;;  %s1743_s29 = scalar_lea.hbm %s2694_s3, 8192 }
  0x69   : > { %p1744_p9 = scmp.lt.u32.totalorder %s2178_s13, %s2694_s3  ;;  %p1745_p12 = scmp.lt.u32.totalorder %s1743_s29, %s1738_s20 }
  0x6a   : > { %p1741_p0 = pnand %p1739_p5, %p2734_p1  ;;  %p1747_p8 = scmp.lt.u32.totalorder %s1738_s20, %s2178_s13 }
  0x6b   : > { %p1746_p4 = por %p1745_p12, %p1744_p9 }
  0x6c   : > { %p1742_p3 = pneg %p1741_p0 }
  0x6d   : > { %p1748_p10 = por %p1747_p8, %p1746_p4 }
  0x6f   : > { %p1749_p2 = pnand %p1748_p10, %p1742_p3 }
  0x71   : > { %1752 = shalt.err (!%p1749_p2)
}
  0x72   : > { %s1753_s25 = scalar_lea.vmem %s2180_s15, 4096  ;;  %p2735_p11 = pmov %p2734_p1 }
  0x73   : > { %p1754_p13 = scmp.ne.s32.totalorder %s2180_s15, %s1753_s25  ;;  %s1903_s10 = smov [#allocation8]  }
  0x74   : > { %s1758_s16 = sshll.u32 %s1903_s10, 4  ;;  %s1759_s16 = int_to_ptr.vmem [resolvable:$false] %s1758_s16 }
  0x75   : > { %p1756_p6 = pnand %p1754_p13, %p2735_p11  ;;  %s1760_s18 = scalar_lea.vmem %s1759_s16, 8192 }
  0x76   : > { %p1761_p1 = scmp.lt.s32.totalorder %s2180_s15, %s1759_s16  ;;  %p1762_p0 = scmp.lt.s32.totalorder %s1760_s18, %s1753_s25 }
  0x77   : > { %p1757_p5 = pneg %p1756_p6 }
  0x78   : > { %p1763_p9 = por %p1762_p0, %p1761_p1 }
  0x7a   : > { %p1764_p12 = pnand %p1763_p9, %p1757_p5 }
  0x7c   : > { %1767 = shalt.err (!%p1764_p12)
}
  0x7d   : > { %1510 = dma.hbm_to_vmem [thread:$0]  (!%p2030_p7), %s2178_s13, 4096, %s2180_s15, %s2037_s6, %s1901_s23, %s1901_s23, %s1902_s4  }
  0x7e   : > { %p2736_p3 = scmp.ne.s32.totalorder %s2722_s8, 0 }
  0x7f   : > { %s2212_s20 = sand.u32 (!%p2736_p3), 1, %s1870_s22   ;;  %p2737_p4 = scmp.ne.s32.totalorder (!%p2736_p3), %s2726_s30, 0 }
  0x80   : > { %281 = sbr.rel (%p2736_p3) target bundleno = 755 (0x2f3), region = 40  ;;  %s1332_s27 = sshll.u32 (!%p2736_p3), %s2212_s20, 7 }
  0x81   : > { %s284_s11 = scalar_lea.sflag (!%p2736_p3), [#allocation4], %s2212_s20  ;;  %s2216_s29 = scalar_lea.vmem (!%p2736_p3), [#allocation3], %s1332_s27 }
  0x87   : > { %1841 = dma.done.wait (%p2737_p4), %s284_s11, 2048  }
  0x88   : > { %1843 = vsyncadd (%p2737_p4), %s284_s11, 4294965248  ;;  %s292_s7 = sand.u32 1, %s2073_s12   ;;  %s294_s6 = sand.u32 1, %s1858_s19  }
  0x89   : > { %s1333_s8 = sshll.u32 %s294_s6, 8  ;;  %s293_s23 = scalar_lea.sflag [#allocation7], %s292_s7 }
  0x8a   : > { %s2224_s4 = scalar_lea.vmem [#allocation6], %s1333_s8  ;;  %p2738_p7 = scmp.ne.s32.totalorder %s2728_s17, 0 }
  0x8c   : > { %1845 = dma.done.wait (%p2738_p7), %s293_s23, 8192  }
  0x8d   : > { %1847 = vsyncadd (%p2738_p7), %s293_s23, 4294959104  ;;  %s1336_s15 = sshll.u32 %s1878_s24, 1  ;;  %s2237_s1 = scalar_lea.vmem [#allocation8], %s1333_s8 }
  0x8e   : > { %p349_p8 = scmp.lt.s32.totalorder %s1336_s15, 3  ;;  %s2239_s9 = scalar_lea.vmem [#allocation9], %s1332_s27 }
  0x8f   : > { %p1337_p10 = scmp.ne.s32.totalorder %s1878_s24, 0 }
  0x90   : > { %s2764_s15 = smov (!%p349_p8, %s1336_s15), 3  ;;  %v1904_v0 = vmov (!%p1337_p10), 0.0  }
  0x91   : > { %s351_s12 = scalar_lea.vmem %s2693_s2, %s2764_s15  ;;  %358 = sbr.rel (%p1337_p10) target bundleno = 153 (0x99), region = 56  ;;  %359 = vst [vmem:[#allocation2] sm:$0xff] (!%p1337_p10), %v1904_v0  ;;  %360 = vst [vmem:[#allocation2 + $0x8] sm:$0xff] (!%p1337_p10), %v1904_v0 }
  0x92   : > { %361 = vst [vmem:[#allocation2 + $0x10] sm:$0xff] (!%p1337_p10), %v1904_v0  ;;  %362 = vst [vmem:[#allocation2 + $0x18] sm:$0xff] (!%p1337_p10), %v1904_v0 }
  0x93   : > { %363 = vst [vmem:[#allocation2 + $0x20] sm:$0xff] (!%p1337_p10), %v1904_v0  ;;  %364 = vst [vmem:[#allocation2 + $0x28] sm:$0xff] (!%p1337_p10), %v1904_v0 }
  0x94   : > { %365 = vst [vmem:[#allocation2 + $0x30] sm:$0xff] (!%p1337_p10), %v1904_v0  ;;  %366 = vst [vmem:[#allocation2 + $0x38] sm:$0xff] (!%p1337_p10), %v1904_v0 }
  0x95   : > { %367 = vst [vmem:[#allocation2 + $0x40] sm:$0xff] (!%p1337_p10), %v1904_v0  ;;  %368 = vst [vmem:[#allocation2 + $0x48] sm:$0xff] (!%p1337_p10), %v1904_v0 }
  0x96   : > { %369 = vst [vmem:[#allocation2 + $0x50] sm:$0xff] (!%p1337_p10), %v1904_v0  ;;  %370 = vst [vmem:[#allocation2 + $0x58] sm:$0xff] (!%p1337_p10), %v1904_v0 }
  0x97   : > { %371 = vst [vmem:[#allocation2 + $0x60] sm:$0xff] (!%p1337_p10), %v1904_v0  ;;  %372 = vst [vmem:[#allocation2 + $0x68] sm:$0xff] (!%p1337_p10), %v1904_v0 }
  0x98   : > { %373 = vst [vmem:[#allocation2 + $0x70] sm:$0xff] %v1904_v0  ;;  %374 = vst [vmem:[#allocation2 + $0x78] sm:$0xff] %v1904_v0 }
  0x99 PF: > { %v392_v1 = vld [vmem:[%s2224_s4 + $0x8] sm:$0xff]  ;;  %v394_v2 = vld [vmem:[%s2224_s4 + $0x18] sm:$0xff]  ;;  %v391_v3 = vld [vmem:[%s2224_s4] sm:$0xff]  ;;  %v1905_v8 = vmov 0.0   ;;  %p1338_p2 = scmp.ne.s32.totalorder %s1878_s24, 1 }
  0x9a   : > { %v1429_v4 = vpack.c.bf16 %v394_v2, %v392_v1  ;;  %v393_v5 = vld [vmem:[%s2224_s4 + $0x10] sm:$0xff]  ;;  %v396_v6 = vld [vmem:[%s2224_s4 + $0x28] sm:$0xff]  ;;  %v398_v7 = vld [vmem:[%s2224_s4 + $0x38] sm:$0xff]  ;;  %499 = vmatprep.mubr.f32.mxu0 %v1905_v8  ;;  %s2739_s18 = sld [smem:[#allocation22_spill]] (!%p1338_p2) }
  0x9b   : > { %v1431_v9 = vpack.c.bf16 %v393_v5, %v391_v3  ;;  %v1433_v10 = vpack.c.bf16 %v398_v7, %v396_v6  ;;  %v395_v11 = vld [vmem:[%s2224_s4 + $0x20] sm:$0xff]  ;;  %v397_v12 = vld [vmem:[%s2224_s4 + $0x30] sm:$0xff]  ;;  %v400_v13 = vld [vmem:[%s2224_s4 + $0x48] sm:$0xff] }
  0x9c   : > { %1430 = vmatprep.subr.bf16.mxu0 %v1429_v4  ;;  %v402_v14 = vld [vmem:[%s2224_s4 + $0x58] sm:$0xff]  ;;  %v1435_v15 = vpack.c.bf16 %v397_v12, %v395_v11  ;;  %v399_v17 = vld [vmem:[%s2224_s4 + $0x40] sm:$0xff]  ;;  %v401_v18 = vld [vmem:[%s2224_s4 + $0x50] sm:$0xff] }
  0x9d   : > { %1432 = vmatpush1.bf16.msra.mxu0 %v1431_v9  ;;  %v1437_v16 = vpack.c.bf16 %v402_v14, %v400_v13  ;;  %v404_v19 = vld [vmem:[%s2224_s4 + $0x68] sm:$0xff]  ;;  %v406_v20 = vld [vmem:[%s2224_s4 + $0x78] sm:$0xff]  ;;  %v1439_v21 = vpack.c.bf16 %v401_v18, %v399_v17  ;;  %v403_v23 = vld [vmem:[%s2224_s4 + $0x60] sm:$0xff] }
  0x9e   : > { %1434 = vmatprep.subr.bf16.mxu0 %v1433_v10  ;;  %v1441_v22 = vpack.c.bf16 %v406_v20, %v404_v19  ;;  %v405_v24 = vld [vmem:[%s2224_s4 + $0x70] sm:$0xff]  ;;  %v408_v25 = vld [vmem:[%s2224_s4 + $0x88] sm:$0xff]  ;;  %v410_v26 = vld [vmem:[%s2224_s4 + $0x98] sm:$0xff] }
  0x9f   : > { %v1443_v27 = vpack.c.bf16 %v405_v24, %v403_v23  ;;  %v1445_v28 = vpack.c.bf16 %v410_v26, %v408_v25  ;;  %v407_v29 = vld [vmem:[%s2224_s4 + $0x80] sm:$0xff]  ;;  %v409_v30 = vld [vmem:[%s2224_s4 + $0x90] sm:$0xff]  ;;  %v412_v31 = vld [vmem:[%s2224_s4 + $0xa8] sm:$0xff] }
  0xa0   : > { %v414_v32 = vld [vmem:[%s2224_s4 + $0xb8] sm:$0xff]  ;;  %v1447_v33 = vpack.c.bf16 %v409_v30, %v407_v29  ;;  %v916_v34 = vld [vmem:[%s2237_s1 + $0x80] sm:$0xff]  ;;  %v917_v35 = vld [vmem:[%s2237_s1 + $0x88] sm:$0xff] }
  0xa1   : > { %1436 = vmatpush1.bf16.msra.mxu0 %v1435_v15  ;;  %v900_v36 = vld [vmem:[%s2237_s1] sm:$0xff]  ;;  %v1449_v37 = vpack.c.bf16 %v414_v32, %v412_v31  ;;  %v413_v39 = vld [vmem:[%s2224_s4 + $0xb0] sm:$0xff]  ;;  %v1461_v40 = vpack.c.bf16 %v917_v35, %v916_v34  ;;  %v901_v41 = vld [vmem:[%s2237_s1 + $0x8] sm:$0xff] }
  0xa2   : > { %1438 = vmatprep.subr.bf16.mxu0 %v1437_v16  ;;  %v411_v38 = vld [vmem:[%s2224_s4 + $0xa0] sm:$0xff]  ;;  %v416_v42 = vld [vmem:[%s2224_s4 + $0xc8] sm:$0xff]  ;;  %v418_v43 = vld [vmem:[%s2224_s4 + $0xd8] sm:$0xff]  ;;  %v1463_v44 = vpack.c.bf16 %v901_v41, %v900_v36 }
  0xa3   : > { %1462 = vmatprep.subr.bf16.mxu1 %v1461_v40  ;;  %v1451_v45 = vpack.c.bf16 %v413_v39, %v411_v38  ;;  %v1453_v46 = vpack.c.bf16 %v418_v43, %v416_v42  ;;  %v415_v47 = vld [vmem:[%s2224_s4 + $0xc0] sm:$0xff]  ;;  %v417_v48 = vld [vmem:[%s2224_s4 + $0xd0] sm:$0xff]  ;;  %v420_v49 = vld [vmem:[%s2224_s4 + $0xe8] sm:$0xff] }
  0xa4   : > { %1464 = vmatpush3.bf16.msra.mxu1 %v1463_v44  ;;  %v422_v50 = vld [vmem:[%s2224_s4 + $0xf8] sm:$0xff]  ;;  %v1455_v51 = vpack.c.bf16 %v417_v48, %v415_v47  ;;  %v419_v53 = vld [vmem:[%s2224_s4 + $0xe0] sm:$0xff]  ;;  %v421_v54 = vld [vmem:[%s2224_s4 + $0xf0] sm:$0xff] }
  0xa5   : > { %1440 = vmatpush1.bf16.msra.mxu0 %v1439_v21  ;;  %v1457_v52 = vpack.c.bf16 %v422_v50, %v420_v49  ;;  %v1459_v55 = vpack.c.bf16 %v421_v54, %v419_v53  ;;  %v375_v56 = vld [vmem:[%s2216_s29] sm:$0xff]  ;;  %v376_v57 = vld [vmem:[%s2216_s29 + $0x8] sm:$0xff]  ;;  %v377_v58 = vld [vmem:[%s2216_s29 + $0x10] sm:$0xff]  ;;  %v425_v50 = vlaneseq }
  0xa6   : > { %1442 = vmatprep.subr.bf16.mxu0 %v1441_v22  ;;  %v378_v59 = vld [vmem:[%s2216_s29 + $0x18] sm:$0xff]  ;;  %v379_v60 = vld [vmem:[%s2216_s29 + $0x20] sm:$0xff]  ;;  %v380_v61 = vld [vmem:[%s2216_s29 + $0x28] sm:$0xff] }
  0xa7   : > { %v381_v62 = vld [vmem:[%s2216_s29 + $0x30] sm:$0xff]  ;;  %v382_v63 = vld [vmem:[%s2216_s29 + $0x38] sm:$0xff]  ;;  %v383_v0 = vld [vmem:[%s2216_s29 + $0x40] sm:$0xff] }
  0xa8   : > { %v384_v1 = vld [vmem:[%s2216_s29 + $0x48] sm:$0xff]  ;;  %v385_v2 = vld [vmem:[%s2216_s29 + $0x50] sm:$0xff]  ;;  %v386_v3 = vld [vmem:[%s2216_s29 + $0x58] sm:$0xff] }
  0xa9   : > { %1444 = vmatpush1.bf16.msra.mxu0 %v1443_v27  ;;  %v387_v4 = vld [vmem:[%s2216_s29 + $0x60] sm:$0xff]  ;;  %v388_v5 = vld [vmem:[%s2216_s29 + $0x68] sm:$0xff]  ;;  %v389_v6 = vld [vmem:[%s2216_s29 + $0x70] sm:$0xff] }
  0xaa   : > { %1446 = vmatprep.subr.bf16.mxu0 %v1445_v28  ;;  %v390_v7 = vld [vmem:[%s2216_s29 + $0x78] sm:$0xff]  ;;  %v918_v9 = vld [vmem:[%s2237_s1 + $0x90] sm:$0xff]  ;;  %v920_v15 = vld [vmem:[%s2237_s1 + $0xa0] sm:$0xff] }
  0xab   : > { %v919_v10 = vld [vmem:[%s2237_s1 + $0x98] sm:$0xff]  ;;  %v902_v12 = vld [vmem:[%s2237_s1 + $0x10] sm:$0xff]  ;;  %v921_v16 = vld [vmem:[%s2237_s1 + $0xa8] sm:$0xff] }
  0xac   : > { %v1465_v11 = vpack.c.bf16 %v919_v10, %v918_v9  ;;  %v903_v13 = vld [vmem:[%s2237_s1 + $0x18] sm:$0xff]  ;;  %v1469_v17 = vpack.c.bf16 %v921_v16, %v920_v15  ;;  %v905_v18 = vld [vmem:[%s2237_s1 + $0x28] sm:$0xff]  ;;  %v922_v20 = vld [vmem:[%s2237_s1 + $0xb0] sm:$0xff] }
  0xad   : > { %1448 = vmatpush1.bf16.msra.mxu0 %v1447_v33  ;;  %v1467_v14 = vpack.c.bf16 %v903_v13, %v902_v12  ;;  %v923_v21 = vld [vmem:[%s2237_s1 + $0xb8] sm:$0xff]  ;;  %v906_v23 = vld [vmem:[%s2237_s1 + $0x30] sm:$0xff]  ;;  %v924_v26 = vld [vmem:[%s2237_s1 + $0xc0] sm:$0xff] }
  0xae   : > { %1450 = vmatprep.subr.bf16.mxu0 %v1449_v37  ;;  %1466 = vmatprep.subr.bf16.mxu1 %v1465_v11  ;;  %v1473_v22 = vpack.c.bf16 %v923_v21, %v922_v20  ;;  %v907_v24 = vld [vmem:[%s2237_s1 + $0x38] sm:$0xff]  ;;  %v925_v27 = vld [vmem:[%s2237_s1 + $0xc8] sm:$0xff]  ;;  %v908_v29 = vld [vmem:[%s2237_s1 + $0x40] sm:$0xff] }
  0xaf   : > { %1468 = vmatpush3.bf16.msra.mxu1 %v1467_v14  ;;  %v1475_v25 = vpack.c.bf16 %v907_v24, %v906_v23  ;;  %v1477_v28 = vpack.c.bf16 %v925_v27, %v924_v26  ;;  %v909_v30 = vld [vmem:[%s2237_s1 + $0x48] sm:$0xff]  ;;  %v926_v32 = vld [vmem:[%s2237_s1 + $0xd0] sm:$0xff]  ;;  %v927_v33 = vld [vmem:[%s2237_s1 + $0xd8] sm:$0xff] }
  0xb0   : > { %1470 = vmatprep.subr.bf16.mxu1 %v1469_v17  ;;  %v1479_v31 = vpack.c.bf16 %v909_v30, %v908_v29  ;;  %v1481_v34 = vpack.c.bf16 %v927_v33, %v926_v32  ;;  %v910_v35 = vld [vmem:[%s2237_s1 + $0x50] sm:$0xff]  ;;  %v911_v36 = vld [vmem:[%s2237_s1 + $0x58] sm:$0xff]  ;;  %v928_v38 = vld [vmem:[%s2237_s1 + $0xe0] sm:$0xff] }
  0xb1   : > { %1452 = vmatpush1.bf16.msra.mxu0 %v1451_v45  ;;  %v1483_v37 = vpack.c.bf16 %v911_v36, %v910_v35  ;;  %v929_v39 = vld [vmem:[%s2237_s1 + $0xe8] sm:$0xff]  ;;  %v912_v41 = vld [vmem:[%s2237_s1 + $0x60] sm:$0xff]  ;;  %v930_v44 = vld [vmem:[%s2237_s1 + $0xf0] sm:$0xff] }
  0xb2   : > { %1454 = vmatprep.subr.bf16.mxu0 %v1453_v46  ;;  %v1485_v40 = vpack.c.bf16 %v929_v39, %v928_v38  ;;  %v913_v42 = vld [vmem:[%s2237_s1 + $0x68] sm:$0xff]  ;;  %v931_v45 = vld [vmem:[%s2237_s1 + $0xf8] sm:$0xff]  ;;  %v914_v47 = vld [vmem:[%s2237_s1 + $0x70] sm:$0xff] }
  0xb3   : > { %v1487_v43 = vpack.c.bf16 %v913_v42, %v912_v41  ;;  %v1489_v46 = vpack.c.bf16 %v931_v45, %v930_v44  ;;  %v915_v48 = vld [vmem:[%s2237_s1 + $0x78] sm:$0xff]  ;;  %v423_v53 = vld [vmem:[%s351_s12] sm:$0x3] }
  0xb4   : > { %v1491_v49 = vpack.c.bf16 %v915_v48, %v914_v47 }
  0xb5   : > { %1456 = vmatpush1.bf16.msra.mxu0 %v1455_v51  ;;  %v426_v51 = vshrl.u32 %v425_v50, 7 }
  0xb6   : > { %1458 = vmatprep.subr.bf16.mxu0 %v1457_v52 }
  0xb7   : > { %v427_v52 = vsub.s32 0, %v426_v51  ;;  %v431_v54 = vsub.s32 1, %v426_v51 }
  0xb9   : > { %1460 = vmatpush1.bf16.msra.mxu0 %v1459_v55  ;;  %v2343_v55 = vrot.slane %v423_v53, %v427_v52 }
  0xbc   : > { %500 = vmatmul.mubr.f32.vlgmr.msra.gmra.mrb[0].mxu0 %v375_v56  ;;  %v2345_v56 = vrot.slane %v423_v53, %v431_v54 }
  0xbd   : > { %505 = vmatprep.mubr.f32.mxu0 %v1905_v8 }
  0xc0   : > { %506 = vmatmul.mubr.f32.gmra.mrb[2].mxu0 %v376_v57 }
  0xc1   : > { %511 = vmatprep.mubr.f32.mxu0 %v1905_v8 }
  0xc4   : > { %512 = vmatmul.mubr.f32.gmra.mrb[4].mxu0 %v377_v58 }
  0xc5   : > { %517 = vmatprep.mubr.f32.mxu0 %v1905_v8 }
  0xc8   : > { %518 = vmatmul.mubr.f32.gmra.mrb[6].mxu0 %v378_v59 }
  0xc9   : > { %523 = vmatprep.mubr.f32.mxu0 %v1905_v8 }
  0xcc   : > { %524 = vmatmul.mubr.f32.gmra.mrb[8].mxu0 %v379_v60 }
  0xcd   : > { %529 = vmatprep.mubr.f32.mxu0 %v1905_v8 }
  0xd0   : > { %530 = vmatmul.mubr.f32.gmra.mrb[10].mxu0 %v380_v61 }
  0xd1   : > { %535 = vmatprep.mubr.f32.mxu0 %v1905_v8 }
  0xd4   : > { %536 = vmatmul.mubr.f32.gmra.mrb[12].mxu0 %v381_v62 }
  0xd5   : > { %541 = vmatprep.mubr.f32.mxu0 %v1905_v8 }
  0xd8   : > { %542 = vmatmul.mubr.f32.gmra.mrb[14].mxu0 %v382_v63 }
  0xd9   : > { %547 = vmatprep.mubr.f32.mxu0 %v1905_v8 }
  0xdc   : > { %548 = vmatmul.mubr.f32.gmra.mrb[16].mxu0 %v383_v0 }
  0xdd   : > { %553 = vmatprep.mubr.f32.mxu0 %v1905_v8 }
  0xe0   : > { %554 = vmatmul.mubr.f32.gmra.mrb[18].mxu0 %v384_v1 }
  0xe1   : > { %559 = vmatprep.mubr.f32.mxu0 %v1905_v8 }
  0xe4   : > { %560 = vmatmul.mubr.f32.gmra.mrb[20].mxu0 %v385_v2 }
  0xe5   : > { %565 = vmatprep.mubr.f32.mxu0 %v1905_v8 }
  0xe8   : > { %566 = vmatmul.mubr.f32.gmra.mrb[22].mxu0 %v386_v3 }
  0xe9   : > { %571 = vmatprep.mubr.f32.mxu0 %v1905_v8 }
  0xec   : > { %572 = vmatmul.mubr.f32.gmra.mrb[24].mxu0 %v387_v4 }
  0xed   : > { %577 = vmatprep.mubr.f32.mxu0 %v1905_v8 }
  0xf0   : > { %578 = vmatmul.mubr.f32.gmra.mrb[26].mxu0 %v388_v5 }
  0xf1   : > { %583 = vmatprep.mubr.f32.mxu0 %v1905_v8 }
  0xf4   : > { %584 = vmatmul.mubr.f32.gmra.mrb[28].mxu0 %v389_v6 }
  0xf5   : > { %589 = vmatprep.mubr.f32.mxu0 %v1905_v8  ;;  %v904_v8 = vld [vmem:[%s2237_s1 + $0x20] sm:$0xff] }
  0xf6   : > { %v1471_v19 = vpack.c.bf16 %v905_v18, %v904_v8 }
  0xf8   : > { %590 = vmatmul.mubr.f32.gmra.mrb[30].mxu0 %v390_v7  ;;  %1472 = vmatpush3.bf16.msra.mxu1 %v1471_v19 }
  0xf9   : > { %1474 = vmatprep.subr.bf16.mxu1 %v1473_v22 }
  0xfc   : > { %1476 = vmatpush3.bf16.msra.mxu1 %v1475_v25 }
  0xfd   : > { %1478 = vmatprep.subr.bf16.mxu1 %v1477_v28 }
 0x100   : > { %1480 = vmatpush3.bf16.msra.mxu1 %v1479_v31 }
 0x101   : > { %1482 = vmatprep.subr.bf16.mxu1 %v1481_v34 }
 0x104   : > { %1484 = vmatpush3.bf16.msra.mxu1 %v1483_v37 }
 0x105   : > { %1486 = vmatprep.subr.bf16.mxu1 %v1485_v40 }
 0x108   : > { %1488 = vmatpush3.bf16.msra.mxu1 %v1487_v43 }
 0x109   : > { %1490 = vmatprep.subr.bf16.mxu1 %v1489_v46 }
 0x10c   : > { %1492 = vmatpush3.bf16.msra.mxu1 %v1491_v49 }
 0x18f   : > { %v501_v57 = vpop.f32.mrb[0].mxu0 }
 0x190   : > { %v502_v58 = vadd.f32 %v501_v57, %v2343_v55  ;;  %v503_v59 = vpop.f32.mrb[1].mxu0 }
 0x191   : > { %v504_v60 = vadd.f32 %v503_v59, %v2345_v56 }
 0x192   : > { %v628_v61 = vmul.f32 0.044715, %v502_v58  ;;  %v596_v46 = vmul.f32 0.5, %v502_v58 }
 0x193   : > { %v507_v62 = vpop.f32.mrb[2].mxu0  ;;  %v629_v63 = vmul.f32 0.044715, %v504_v60  ;;  %v597_v51 = vmul.f32 0.5, %v504_v60 }
 0x194   : > { %v660_v0 = vmul.f32 %v628_v61, %v502_v58  ;;  %v2350_v1 = vadd.f32 %v507_v62, %v2343_v55  ;;  %v509_v2 = vpop.f32.mrb[3].mxu0 }
 0x195   : > { %v2353_v3 = vadd.f32 %v509_v2, %v2345_v56  ;;  %v661_v4 = vmul.f32 %v629_v63, %v504_v60 }
 0x196   : > { %v630_v5 = vmul.f32 0.044715, %v2350_v1  ;;  %v692_v6 = vmul.f32 %v660_v0, %v502_v58  ;;  %v598_v2 = vmul.f32 0.5, %v2350_v1 }
 0x197   : > { %v631_v7 = vmul.f32 0.044715, %v2353_v3  ;;  %v513_v9 = vpop.f32.mrb[4].mxu0  ;;  %v693_v10 = vmul.f32 %v661_v4, %v504_v60 }
 0x198   : > { %v662_v11 = vmul.f32 %v630_v5, %v2350_v1  ;;  %v2359_v12 = vadd.f32 %v513_v9, %v2343_v55  ;;  %v515_v13 = vpop.f32.mrb[5].mxu0  ;;  %v724_v14 = vadd.f32 %v692_v6, %v502_v58 }
 0x199   : > { %v663_v15 = vmul.f32 %v631_v7, %v2353_v3  ;;  %v2363_v16 = vadd.f32 %v515_v13, %v2345_v56  ;;  %v725_v17 = vadd.f32 %v693_v10, %v504_v60 }
 0x19a   : > { %v632_v8 = vmul.f32 0.044715, %v2359_v12  ;;  %v756_v18 = vmul.f32 0.7978846, %v724_v14  ;;  %v694_v19 = vmul.f32 %v662_v11, %v2350_v1 }
 0x19b   : > { %v633_v20 = vmul.f32 0.044715, %v2363_v16  ;;  %v519_v21 = vpop.f32.mrb[6].mxu0  ;;  %v757_v22 = vmul.f32 0.7978846, %v725_v17  ;;  %v695_v23 = vmul.f32 %v663_v15, %v2353_v3 }
 0x19c   : > { %v664_v24 = vmul.f32 %v632_v8, %v2359_v12  ;;  %v2371_v25 = vadd.f32 %v519_v21, %v2343_v55  ;;  %v521_v26 = vpop.f32.mrb[7].mxu0  ;;  %1614 = vtanh.f32 %v756_v18  ;;  %v726_v27 = vadd.f32 %v694_v19, %v2350_v1 }
 0x19d   : > { %v665_v28 = vmul.f32 %v633_v20, %v2363_v16  ;;  %v2376_v29 = vadd.f32 %v521_v26, %v2345_v56  ;;  %1616 = vtanh.f32 %v757_v22  ;;  %v727_v30 = vadd.f32 %v695_v23, %v2353_v3 }
 0x19e   : > { %v634_v31 = vmul.f32 0.044715, %v2371_v25  ;;  %v758_v32 = vmul.f32 0.7978846, %v726_v27  ;;  %v696_v33 = vmul.f32 %v664_v24, %v2359_v12  ;;  %v599_v8 = vmul.f32 0.5, %v2353_v3 }
 0x19f   : > { %v635_v34 = vmul.f32 0.044715, %v2376_v29  ;;  %v525_v35 = vpop.f32.mrb[8].mxu0  ;;  %v759_v36 = vmul.f32 0.7978846, %v727_v30  ;;  %v697_v37 = vmul.f32 %v665_v28, %v2363_v16  ;;  %v600_v19 = vmul.f32 0.5, %v2359_v12 }
 0x1a0   : > { %v666_v38 = vmul.f32 %v634_v31, %v2371_v25  ;;  %v2385_v39 = vadd.f32 %v525_v35, %v2343_v55  ;;  %v527_v40 = vpop.f32.mrb[9].mxu0  ;;  %1618 = vtanh.f32 %v758_v32  ;;  %v728_v41 = vadd.f32 %v696_v33, %v2359_v12 }
 0x1a1   : > { %v667_v42 = vmul.f32 %v635_v34, %v2376_v29  ;;  %v2390_v43 = vadd.f32 %v527_v40, %v2345_v56  ;;  %1620 = vtanh.f32 %v759_v36  ;;  %v729_v44 = vadd.f32 %v697_v37, %v2363_v16 }
 0x1a2   : > { %v636_v45 = vmul.f32 0.044715, %v2385_v39  ;;  %v760_v47 = vmul.f32 0.7978846, %v728_v41  ;;  %v698_v48 = vmul.f32 %v666_v38, %v2371_v25 }
 0x1a3   : > { %v637_v49 = vmul.f32 0.044715, %v2390_v43  ;;  %v531_v50 = vpop.f32.mrb[10].mxu0  ;;  %v761_v52 = vmul.f32 0.7978846, %v729_v44  ;;  %v699_v53 = vmul.f32 %v667_v42, %v2376_v29 }
 0x1a4   : > { %v668_v54 = vmul.f32 %v636_v45, %v2385_v39  ;;  %v2399_v57 = vadd.f32 %v531_v50, %v2343_v55  ;;  %v533_v59 = vpop.f32.mrb[11].mxu0  ;;  %1622 = vtanh.f32 %v760_v47  ;;  %v730_v61 = vadd.f32 %v698_v48, %v2371_v25 }
 0x1a5   : > { %v669_v58 = vmul.f32 %v637_v49, %v2390_v43  ;;  %v2404_v62 = vadd.f32 %v533_v59, %v2345_v56  ;;  %1624 = vtanh.f32 %v761_v52  ;;  %v731_v60 = vadd.f32 %v699_v53, %v2376_v29 }
 0x1a6   : > { %v1615_v63 = vpop.eup %1614  ;;  %v638_v0 = vmul.f32 0.044715, %v2399_v57  ;;  %v762_v4 = vmul.f32 0.7978846, %v730_v61  ;;  %v700_v5 = vmul.f32 %v668_v54, %v2385_v39  ;;  %v601_v52 = vmul.f32 0.5, %v2363_v16 }
 0x1a7   : > { %v1617_v6 = vpop.eup %1616  ;;  %v639_v7 = vmul.f32 0.044715, %v2404_v62  ;;  %v537_v9 = vpop.f32.mrb[12].mxu0  ;;  %v820_v10 = vadd.f32 1.0, %v1615_v63  ;;  %v763_v11 = vmul.f32 0.7978846, %v731_v60  ;;  %v701_v13 = vmul.f32 %v669_v58, %v2390_v43 }
 0x1a8   : > { %v2413_v14 = vadd.f32 %v537_v9, %v2343_v55  ;;  %v539_v15 = vpop.f32.mrb[13].mxu0  ;;  %v821_v17 = vadd.f32 1.0, %v1617_v6  ;;  %1626 = vtanh.f32 %v762_v4  ;;  %v670_v21 = vmul.f32 %v638_v0, %v2399_v57 }
 0x1a9   : > { %v671_v1 = vmul.f32 %v639_v7, %v2404_v62  ;;  %v2418_v18 = vadd.f32 %v539_v15, %v2345_v56  ;;  %1628 = vtanh.f32 %v763_v11  ;;  %v733_v23 = vadd.f32 %v701_v13, %v2390_v43 }
 0x1aa   : > { %v1619_v20 = vpop.eup %1618  ;;  %v853_v22 = vmul.f32 %v821_v17, %v597_v51  ;;  %v732_v24 = vadd.f32 %v700_v5, %v2385_v39  ;;  %v852_v28 = vmul.f32 %v820_v10, %v596_v46  ;;  %v640_v32 = vmul.f32 0.044715, %v2413_v14 }
 0x1ab   : > { %v1621_v26 = vpop.eup %1620  ;;  %v641_v3 = vmul.f32 0.044715, %v2418_v18  ;;  %v543_v27 = vpop.f32.mrb[14].mxu0  ;;  %v822_v30 = vadd.f32 1.0, %v1619_v20  ;;  %v703_v31 = vmul.f32 %v671_v1, %v2404_v62  ;;  %v765_v34 = vmul.f32 0.7978846, %v733_v23 }
 0x1ac   : > { %v545_v12 = vpop.f32.mrb[15].mxu0  ;;  %996 = vmatprep.mubr.f32.mxu1 %v853_v22  ;;  %v823_v33 = vadd.f32 1.0, %v1621_v26  ;;  %v2429_v36 = vadd.f32 %v543_v27, %v2343_v55  ;;  %v764_v38 = vmul.f32 0.7978846, %v732_v24  ;;  %v702_v49 = vmul.f32 %v670_v21, %v2399_v57 }
 0x1ad   : > { %v673_v35 = vmul.f32 %v641_v3, %v2418_v18  ;;  %v2432_v37 = vadd.f32 %v545_v12, %v2345_v56  ;;  %997 = vmatmul.mubr.f32.vlgmr.msra.gmra.mrb[0].mxu1 %v852_v28  ;;  %v854_v42 = vmul.f32 %v822_v30, %v598_v2  ;;  %1630 = vtanh.f32 %v765_v34 }
 0x1ae   : > { %v1623_v40 = vpop.eup %1622  ;;  %v855_v41 = vmul.f32 %v823_v33, %v599_v8  ;;  %v735_v44 = vadd.f32 %v703_v31, %v2404_v62  ;;  %1632 = vtanh.f32 %v764_v38  ;;  %v672_v59 = vmul.f32 %v640_v32, %v2413_v14 }
 0x1af   : > { %v1625_v45 = vpop.eup %1624  ;;  %v643_v46 = vmul.f32 0.044715, %v2432_v37  ;;  %v549_v47 = vpop.f32.mrb[16].mxu0  ;;  %v824_v48 = vadd.f32 1.0, %v1623_v40  ;;  %v602_v58 = vmul.f32 0.5, %v2371_v25  ;;  %v734_v60 = vadd.f32 %v702_v49, %v2399_v57 }
 0x1b0   : > { %v2438_v50 = vadd.f32 %v549_v47, %v2343_v55  ;;  %v551_v51 = vpop.f32.mrb[17].mxu0  ;;  %1001 = vmatprep.mubr.f32.mxu1 %v855_v41  ;;  %v825_v53 = vadd.f32 1.0, %v1625_v45  ;;  %v767_v54 = vmul.f32 0.7978846, %v735_v44  ;;  %v642_v0 = vmul.f32 0.044715, %v2429_v36 }
 0x1b1   : > { %v2443_v61 = vadd.f32 %v551_v51, %v2345_v56  ;;  %1002 = vmatmul.mubr.f32.gmra.mrb[2].mxu1 %v854_v42  ;;  %v675_v2 = vmul.f32 %v643_v46, %v2432_v37  ;;  %v856_v6 = vmul.f32 %v824_v48, %v600_v19  ;;  %v766_v9 = vmul.f32 0.7978846, %v734_v60 }
 0x1b2   : > { %v1627_v63 = vpop.eup %1626  ;;  %v857_v4 = vmul.f32 %v825_v53, %v601_v52  ;;  %1634 = vtanh.f32 %v767_v54  ;;  %v705_v10 = vmul.f32 %v673_v35, %v2418_v18  ;;  %v644_v11 = vmul.f32 0.044715, %v2438_v50 }
 0x1b3   : > { %v1629_v16 = vpop.eup %1628  ;;  %v555_v5 = vpop.f32.mrb[18].mxu0  ;;  %v826_v7 = vadd.f32 1.0, %v1627_v63  ;;  %v603_v25 = vmul.f32 0.5, %v2376_v29  ;;  %v604_v17 = vmul.f32 0.5, %v2385_v39  ;;  %v645_v8 = vmul.f32 0.044715, %v2443_v61 }
 0x1b4   : > { %v557_v13 = vpop.f32.mrb[19].mxu0  ;;  %1006 = vmatprep.mubr.f32.mxu1 %v857_v4  ;;  %v827_v15 = vadd.f32 1.0, %v1629_v16  ;;  %v605_v1 = vmul.f32 0.5, %v2390_v43  ;;  %v2456_v19 = vmul.f32 0.5, %v2399_v57  ;;  %1636 = vtanh.f32 %v766_v9 }
 0x1b5   : > { %1007 = vmatmul.mubr.f32.gmra.mrb[4].mxu1 %v856_v6  ;;  %v607_v21 = vmul.f32 0.5, %v2404_v62  ;;  %v737_v22 = vadd.f32 %v705_v10, %v2418_v18  ;;  %v704_v23 = vmul.f32 %v672_v59, %v2413_v14  ;;  %v674_v29 = vmul.f32 %v642_v0, %v2429_v36 }
 0x1b6   : > { %v859_v20 = vmul.f32 %v827_v15, %v603_v25  ;;  %v2463_v39 = vadd.f32 %v557_v13, %v2345_v56  ;;  %v858_v26 = vmul.f32 %v826_v7, %v602_v58  ;;  %v707_v43 = vmul.f32 %v675_v2, %v2432_v37 }
 0x1b7   : > { %v561_v24 = vpop.f32.mrb[20].mxu0  ;;  %v1631_v3 = vpop.eup %1630  ;;  %v676_v57 = vmul.f32 %v644_v11, %v2438_v50  ;;  %v2468_v27 = vadd.f32 %v555_v5, %v2343_v55  ;;  %v769_v28 = vmul.f32 0.7978846, %v737_v22  ;;  %v736_v30 = vadd.f32 %v704_v23, %v2413_v14 }
 0x1b8   : > { %v563_v62 = vpop.f32.mrb[21].mxu0  ;;  %1011 = vmatprep.mubr.f32.mxu1 %v859_v20  ;;  %v1633_v31 = vpop.eup %1632  ;;  %v677_v32 = vmul.f32 %v645_v8, %v2443_v61  ;;  %v2473_v12 = vadd.f32 %v561_v24, %v2343_v55  ;;  %v829_v33 = vadd.f32 1.0, %v1631_v3  ;;  %v739_v34 = vadd.f32 %v707_v43, %v2432_v37 }
 0x1b9   : > { %1012 = vmatmul.mubr.f32.gmra.mrb[6].mxu1 %v858_v26  ;;  %v2477_v35 = vadd.f32 %v563_v62, %v2345_v56  ;;  %v828_v38 = vadd.f32 1.0, %v1633_v31  ;;  %1638 = vtanh.f32 %v769_v28  ;;  %v768_v40 = vmul.f32 0.7978846, %v736_v30 }
 0x1ba   : > { %v647_v41 = vmul.f32 0.044715, %v2463_v39  ;;  %v861_v44 = vmul.f32 %v829_v33, %v605_v1  ;;  %v771_v45 = vmul.f32 0.7978846, %v739_v34  ;;  %v706_v46 = vmul.f32 %v674_v29, %v2429_v36 }
 0x1bb   : > { %v567_v42 = vpop.f32.mrb[22].mxu0  ;;  %v646_v48 = vmul.f32 0.044715, %v2468_v27  ;;  %v860_v51 = vmul.f32 %v828_v38, %v604_v17  ;;  %v609_v52 = vmul.f32 0.5, %v2418_v18  ;;  %1640 = vtanh.f32 %v768_v40 }
 0x1bc   : > { %v1635_v47 = vpop.eup %1634  ;;  %v569_v49 = vpop.f32.mrb[23].mxu0  ;;  %v648_v53 = vmul.f32 0.044715, %v2473_v12  ;;  %1016 = vmatprep.mubr.f32.mxu1 %v861_v44  ;;  %v608_v59 = vmul.f32 0.5, %v2413_v14  ;;  %1642 = vtanh.f32 %v771_v45  ;;  %v649_v58 = vmul.f32 0.044715, %v2477_v35 }
 0x1bd   : > { %v831_v54 = vadd.f32 1.0, %v1635_v47  ;;  %v2487_v60 = vadd.f32 %v567_v42, %v2343_v55  ;;  %1017 = vmatmul.mubr.f32.gmra.mrb[8].mxu1 %v860_v51  ;;  %v738_v63 = vadd.f32 %v706_v46, %v2429_v36  ;;  %v709_v0 = vmul.f32 %v677_v32, %v2443_v61 }
 0x1be   : > { %v1637_v2 = vpop.eup %1636  ;;  %v679_v18 = vmul.f32 %v647_v41, %v2463_v39  ;;  %v2493_v4 = vadd.f32 %v569_v49, %v2345_v56  ;;  %v708_v14 = vmul.f32 %v676_v57, %v2438_v50  ;;  %v678_v6 = vmul.f32 %v646_v48, %v2468_v27 }
 0x1bf   : > { %v573_v16 = vpop.f32.mrb[24].mxu0  ;;  %v863_v5 = vmul.f32 %v831_v54, %v607_v21  ;;  %v830_v9 = vadd.f32 1.0, %v1637_v2  ;;  %v611_v10 = vmul.f32 0.5, %v2432_v37  ;;  %v770_v11 = vmul.f32 0.7978846, %v738_v63 }
 0x1c0   : > { %v575_v7 = vpop.f32.mrb[25].mxu0  ;;  %v680_v13 = vmul.f32 %v648_v53, %v2473_v12  ;;  %v2500_v25 = vmul.f32 0.5, %v2429_v36  ;;  %v741_v15 = vadd.f32 %v709_v0, %v2443_v61  ;;  %v740_v17 = vadd.f32 %v708_v14, %v2438_v50 }
 0x1c1   : > { %1021 = vmatprep.mubr.f32.mxu1 %v863_v5  ;;  %v681_v8 = vmul.f32 %v649_v58, %v2477_v35  ;;  %v650_v1 = vmul.f32 0.044715, %v2487_v60  ;;  %v862_v20 = vmul.f32 %v830_v9, %v2456_v19  ;;  %1644 = vtanh.f32 %v770_v11 }
 0x1c2   : > { %v651_v37 = vmul.f32 0.044715, %v2493_v4  ;;  %v2509_v22 = vmul.f32 0.5, %v2443_v61  ;;  %v773_v23 = vmul.f32 0.7978846, %v741_v15  ;;  %v711_v36 = vmul.f32 %v679_v18, %v2463_v39 }
 0x1c3   : > { %v579_v21 = vpop.f32.mrb[26].mxu0  ;;  %v1639_v29 = vpop.eup %1638  ;;  %v2513_v24 = vadd.f32 %v573_v16, %v2343_v55  ;;  %1022 = vmatmul.mubr.f32.gmra.mrb[10].mxu1 %v862_v20  ;;  %v772_v19 = vmul.f32 0.7978846, %v740_v17  ;;  %v710_v3 = vmul.f32 %v678_v6, %v2468_v27  ;;  %v2520_v57 = vadd.f32 %v575_v7, %v2345_v56 }
 0x1c4   : > { %v2516_v26 = vadd.f32 %v579_v21, %v2343_v55  ;;  %v581_v43 = vpop.f32.mrb[27].mxu0  ;;  %v833_v61 = vadd.f32 1.0, %v1639_v29  ;;  %1646 = vtanh.f32 %v773_v23  ;;  %v2523_v62 = vmul.f32 0.5, %v2438_v50 }
 0x1c5   : > { %v1641_v28 = vpop.eup %1640  ;;  %v682_v30 = vmul.f32 %v650_v1, %v2487_v60  ;;  %1648 = vtanh.f32 %v772_v19  ;;  %v743_v31 = vadd.f32 %v711_v36, %v2463_v39  ;;  %v742_v32 = vadd.f32 %v710_v3, %v2468_v27 }
 0x1c6   : > { %v1643_v33 = vpop.eup %1642  ;;  %v683_v34 = vmul.f32 %v651_v37, %v2493_v4  ;;  %v2530_v38 = vadd.f32 %v581_v43, %v2345_v56  ;;  %v865_v40 = vmul.f32 %v833_v61, %v609_v52  ;;  %v832_v41 = vadd.f32 1.0, %v1641_v28 }
 0x1c7   : > { %v585_v42 = vpop.f32.mrb[28].mxu0  ;;  %v652_v50 = vmul.f32 0.044715, %v2513_v24  ;;  %v835_v46 = vadd.f32 1.0, %v1643_v33  ;;  %v775_v47 = vmul.f32 0.7978846, %v743_v31  ;;  %v713_v58 = vmul.f32 %v681_v8, %v2477_v35 }
 0x1c8   : > { %v2534_v44 = vadd.f32 %v585_v42, %v2343_v55  ;;  %v587_v45 = vpop.f32.mrb[29].mxu0  ;;  %v653_v48 = vmul.f32 0.044715, %v2520_v57  ;;  %1026 = vmatprep.mubr.f32.mxu1 %v865_v40  ;;  %v864_v49 = vmul.f32 %v832_v41, %v608_v59  ;;  %v774_v53 = vmul.f32 0.7978846, %v742_v32 }
 0x1c9   : > { %v2538_v51 = vadd.f32 %v587_v45, %v2345_v56  ;;  %v654_v52 = vmul.f32 0.044715, %v2516_v26  ;;  %v867_v54 = vmul.f32 %v835_v46, %v611_v10  ;;  %1650 = vtanh.f32 %v775_v47 }
 0x1ca   : > { %v655_v63 = vmul.f32 0.044715, %v2530_v38  ;;  %1027 = vmatmul.mubr.f32.gmra.mrb[12].mxu1 %v864_v49  ;;  %v615_v2 = vmul.f32 0.5, %v2463_v39  ;;  %1652 = vtanh.f32 %v774_v53  ;;  %v712_v18 = vmul.f32 %v680_v13, %v2473_v12 }
 0x1cb   : > { %v591_v0 = vpop.f32.mrb[30].mxu0  ;;  %v1645_v59 = vpop.eup %1644  ;;  %v684_v16 = vmul.f32 %v652_v50, %v2513_v24  ;;  %1031 = vmatprep.mubr.f32.mxu1 %v867_v54  ;;  %v614_v6 = vmul.f32 0.5, %v2468_v27  ;;  %v745_v7 = vadd.f32 %v713_v58, %v2477_v35  ;;  %v685_v9 = vmul.f32 %v653_v48, %v2520_v57 }
 0x1cc   : > { %v2547_v5 = vadd.f32 %v591_v0, %v2343_v55  ;;  %v593_v14 = vpop.f32.mrb[31].mxu0  ;;  %v834_v10 = vadd.f32 1.0, %v1645_v59  ;;  %v744_v11 = vadd.f32 %v712_v18, %v2473_v12  ;;  %v686_v13 = vmul.f32 %v654_v52, %v2516_v26 }
 0x1cd   : > { %v2553_v39 = vadd.f32 %v593_v14, %v2345_v56  ;;  %v657_v15 = vmul.f32 0.044715, %v2538_v51  ;;  %v777_v17 = vmul.f32 0.7978846, %v745_v7  ;;  %v715_v55 = vmul.f32 %v683_v34, %v2493_v4 }
 0x1ce   : > { %v1647_v8 = vpop.eup %1646  ;;  %v687_v27 = vmul.f32 %v655_v63, %v2530_v38  ;;  %v866_v1 = vmul.f32 %v834_v10, %v2500_v25  ;;  %v776_v20 = vmul.f32 0.7978846, %v744_v11  ;;  %v714_v37 = vmul.f32 %v682_v30, %v2487_v60 }
 0x1cf   : > { %v1649_v21 = vpop.eup %1648  ;;  %v656_v56 = vmul.f32 0.044715, %v2534_v44  ;;  %v837_v23 = vadd.f32 1.0, %v1647_v8  ;;  %1654 = vtanh.f32 %v777_v17  ;;  %v747_v36 = vadd.f32 %v715_v55, %v2493_v4 }
 0x1d0   : > { %1032 = vmatmul.mubr.f32.gmra.mrb[14].mxu1 %v866_v1  ;;  %v659_v29 = vmul.f32 0.044715, %v2553_v39  ;;  %v836_v43 = vadd.f32 1.0, %v1649_v21  ;;  %1656 = vtanh.f32 %v776_v20  ;;  %v746_v19 = vadd.f32 %v714_v37, %v2487_v60 }
 0x1d1   : > { %v689_v3 = vmul.f32 %v657_v15, %v2538_v51  ;;  %v869_v25 = vmul.f32 %v837_v23, %v2509_v22  ;;  %v779_v61 = vmul.f32 0.7978846, %v747_v36  ;;  %v717_v28 = vmul.f32 %v685_v9, %v2520_v57 }
 0x1d2   : > { %v658_v30 = vmul.f32 0.044715, %v2547_v5  ;;  %v868_v31 = vmul.f32 %v836_v43, %v2523_v62  ;;  %v778_v32 = vmul.f32 0.7978846, %v746_v19  ;;  %v716_v33 = vmul.f32 %v684_v16, %v2513_v24 }
 0x1d3   : > { %v1651_v34 = vpop.eup %1650  ;;  %v688_v40 = vmul.f32 %v656_v56, %v2534_v44  ;;  %1036 = vmatprep.mubr.f32.mxu1 %v869_v25  ;;  %1658 = vtanh.f32 %v779_v61  ;;  %v749_v41 = vadd.f32 %v717_v28, %v2520_v57  ;;  %v719_v42 = vmul.f32 %v687_v27, %v2530_v38 }
 0x1d4   : > { %v1653_v22 = vpop.eup %1652  ;;  %v691_v50 = vmul.f32 %v659_v29, %v2553_v39  ;;  %1037 = vmatmul.mubr.f32.gmra.mrb[16].mxu1 %v868_v31  ;;  %v839_v45 = vadd.f32 1.0, %v1651_v34  ;;  %1660 = vtanh.f32 %v778_v32  ;;  %v748_v62 = vadd.f32 %v716_v33, %v2513_v24 }
 0x1d5   : > { %v838_v46 = vadd.f32 1.0, %v1653_v22  ;;  %v781_v47 = vmul.f32 0.7978846, %v749_v41  ;;  %v751_v48 = vadd.f32 %v719_v42, %v2530_v38  ;;  %v718_v49 = vmul.f32 %v686_v13, %v2516_v26 }
 0x1d6   : > { %v690_v53 = vmul.f32 %v658_v30, %v2547_v5  ;;  %v871_v52 = vmul.f32 %v839_v45, %v615_v2  ;;  %v780_v54 = vmul.f32 0.7978846, %v748_v62  ;;  %v721_v58 = vmul.f32 %v689_v3, %v2538_v51 }
 0x1d7   : > { %v870_v63 = vmul.f32 %v838_v46, %v614_v6  ;;  %1662 = vtanh.f32 %v781_v47  ;;  %v783_v0 = vmul.f32 0.7978846, %v751_v48  ;;  %v750_v18 = vadd.f32 %v718_v49, %v2516_v26 }
 0x1d8   : > { %1041 = vmatprep.mubr.f32.mxu1 %v871_v52  ;;  %1664 = vtanh.f32 %v780_v54  ;;  %v753_v59 = vadd.f32 %v721_v58, %v2538_v51  ;;  %v720_v16 = vmul.f32 %v688_v40, %v2534_v44  ;;  %v617_v7 = vmul.f32 0.5, %v2477_v35 }
 0x1d9   : > { %v1655_v14 = vpop.eup %1654  ;;  %1042 = vmatmul.mubr.f32.gmra.mrb[18].mxu1 %v870_v63  ;;  %1666 = vtanh.f32 %v783_v0  ;;  %v782_v2 = vmul.f32 0.7978846, %v750_v18  ;;  %v723_v9 = vmul.f32 %v691_v50, %v2553_v39  ;;  %v616_v11 = vmul.f32 0.5, %v2473_v12 }
 0x1da   : > { %v1657_v10 = vpop.eup %1656  ;;  %v841_v6 = vadd.f32 1.0, %v1655_v14  ;;  %v785_v13 = vmul.f32 0.7978846, %v753_v59  ;;  %v752_v15 = vadd.f32 %v720_v16, %v2534_v44  ;;  %v722_v8 = vmul.f32 %v690_v53, %v2547_v5  ;;  %v884_v59 = vld [vmem:[#allocation2] sm:$0xff] }
 0x1db   : > { %v840_v17 = vadd.f32 1.0, %v1657_v10  ;;  %1668 = vtanh.f32 %v782_v2  ;;  %v755_v55 = vadd.f32 %v723_v9, %v2553_v39  ;;  %v619_v12 = vmul.f32 0.5, %v2493_v4  ;;  %v885_v2 = vld [vmem:[#allocation2 + $0x8] sm:$0xff] }
 0x1dc   : > { %v873_v27 = vmul.f32 %v841_v6, %v617_v7  ;;  %1670 = vtanh.f32 %v785_v13  ;;  %v784_v35 = vmul.f32 0.7978846, %v752_v15  ;;  %v754_v21 = vadd.f32 %v722_v8, %v2547_v5 }
 0x1dd   : > { %v1659_v1 = vpop.eup %1658  ;;  %v872_v20 = vmul.f32 %v840_v17, %v616_v11  ;;  %v787_v37 = vmul.f32 0.7978846, %v755_v55  ;;  %v618_v36 = vmul.f32 0.5, %v2487_v60  ;;  %v621_v28 = vmul.f32 0.5, %v2520_v57  ;;  %v886_v11 = vld [vmem:[#allocation2 + $0x10] sm:$0xff]  ;;  %v887_v55 = vld [vmem:[#allocation2 + $0x18] sm:$0xff] }
 0x1de   : > { %v1661_v56 = vpop.eup %1660  ;;  %1046 = vmatprep.mubr.f32.mxu1 %v873_v27  ;;  %v843_v23 = vadd.f32 1.0, %v1659_v1  ;;  %1672 = vtanh.f32 %v784_v35  ;;  %v786_v43 = vmul.f32 0.7978846, %v754_v21  ;;  %v620_v4 = vmul.f32 0.5, %v2513_v24 }
 0x1df   : > { %1047 = vmatmul.mubr.f32.gmra.mrb[20].mxu1 %v872_v20  ;;  %v842_v29 = vadd.f32 1.0, %v1661_v56  ;;  %1674 = vtanh.f32 %v787_v37  ;;  %v623_v60 = vmul.f32 0.5, %v2530_v38  ;;  %v622_v45 = vmul.f32 0.5, %v2516_v26  ;;  %v888_v20 = vld [vmem:[#allocation2 + $0x20] sm:$0xff] }
 0x1e0   : > { %v875_v19 = vmul.f32 %v843_v23, %v619_v12  ;;  %1676 = vtanh.f32 %v786_v43  ;;  %v625_v57 = vmul.f32 0.5, %v2538_v51  ;;  %v627_v38 = vmul.f32 0.5, %v2553_v39  ;;  %v889_v23 = vld [vmem:[#allocation2 + $0x28] sm:$0xff] }
 0x1e1   : > { %v1663_v3 = vpop.eup %1662  ;;  %v874_v25 = vmul.f32 %v842_v29, %v618_v36  ;;  %v624_v54 = vmul.f32 0.5, %v2534_v44  ;;  %v626_v51 = vmul.f32 0.5, %v2547_v5 }
 0x1e2   : > { %v1665_v61 = vpop.eup %1664  ;;  %1051 = vmatprep.mubr.f32.mxu1 %v875_v19  ;;  %v845_v30 = vadd.f32 1.0, %v1663_v3  ;;  %v890_v3 = vld [vmem:[#allocation2 + $0x30] sm:$0xff] }
 0x1e3   : > { %v1667_v31 = vpop.eup %1666  ;;  %1052 = vmatmul.mubr.f32.gmra.mrb[22].mxu1 %v874_v25  ;;  %v844_v32 = vadd.f32 1.0, %v1665_v61 }
 0x1e4   : > { %v877_v33 = vmul.f32 %v845_v30, %v621_v28  ;;  %v847_v34 = vadd.f32 1.0, %v1667_v31  ;;  %v891_v31 = vld [vmem:[#allocation2 + $0x38] sm:$0xff] }
 0x1e5   : > { %v1669_v40 = vpop.eup %1668  ;;  %v876_v41 = vmul.f32 %v844_v32, %v620_v4 }
 0x1e6   : > { %v1671_v42 = vpop.eup %1670  ;;  %1056 = vmatprep.mubr.f32.mxu1 %v877_v33  ;;  %v879_v22 = vmul.f32 %v847_v34, %v623_v60  ;;  %v846_v50 = vadd.f32 1.0, %v1669_v40  ;;  %v892_v34 = vld [vmem:[#allocation2 + $0x40] sm:$0xff] }
 0x1e7   : > { %1057 = vmatmul.mubr.f32.gmra.mrb[24].mxu1 %v876_v41  ;;  %v849_v62 = vadd.f32 1.0, %v1671_v42 }
 0x1e8   : > { %v1673_v46 = vpop.eup %1672  ;;  %1061 = vmatprep.mubr.f32.mxu1 %v879_v22  ;;  %v878_v47 = vmul.f32 %v846_v50, %v622_v45  ;;  %v893_v50 = vld [vmem:[#allocation2 + $0x48] sm:$0xff] }
 0x1e9   : > { %v1675_v24 = vpop.eup %1674  ;;  %v881_v48 = vmul.f32 %v849_v62, %v625_v57  ;;  %v848_v49 = vadd.f32 1.0, %v1673_v46 }
 0x1ea   : > { %v851_v53 = vadd.f32 1.0, %v1675_v24  ;;  %v1677_v52 = vpop.eup %1676  ;;  %v894_v24 = vld [vmem:[#allocation2 + $0x50] sm:$0xff] }
 0x1eb   : > { %1062 = vmatmul.mubr.f32.gmra.mrb[26].mxu1 %v878_v47  ;;  %v880_v63 = vmul.f32 %v848_v49, %v624_v54  ;;  %v850_v26 = vadd.f32 1.0, %v1677_v52 }
 0x1ec   : > { %1066 = vmatprep.mubr.f32.mxu1 %v881_v48  ;;  %v883_v58 = vmul.f32 %v851_v53, %v627_v38  ;;  %v895_v53 = vld [vmem:[#allocation2 + $0x58] sm:$0xff] }
 0x1ed   : > { %v882_v0 = vmul.f32 %v850_v26, %v626_v51  ;;  %v896_v26 = vld [vmem:[#allocation2 + $0x60] sm:$0xff] }
 0x1ef   : > { %1067 = vmatmul.mubr.f32.gmra.mrb[28].mxu1 %v880_v63 }
 0x1f0   : > { %1071 = vmatprep.mubr.f32.mxu1 %v883_v58 }
 0x1f3   : > { %1072 = vmatmul.mubr.f32.gmra.mrb[30].mxu1 %v882_v0 }
 0x280   : > { %v1381_v18 = vpop.f32.mrb[0].mxu1 }
 0x281   : > { %v1382_v16 = vpop.f32.mrb[1].mxu1 }
 0x282   : > { %v1383_v14 = vadd.f32 %v1382_v16, %v1381_v18  ;;  %v897_v16 = vld [vmem:[#allocation2 + $0x68] sm:$0xff] }
 0x284   : > { %v1077_v39 = vadd.f32 %v1383_v14, %v884_v59  ;;  %v1384_v7 = vpop.f32.mrb[2].mxu1 }
 0x285   : > { %v1385_v9 = vpop.f32.mrb[3].mxu1 }
 0x286   : > { %1093 = vst [vmem:[#allocation2] sm:$0xff] %v1077_v39  ;;  %v1386_v44 = vadd.f32 %v1385_v9, %v1384_v7  ;;  %v898_v9 = vld [vmem:[#allocation2 + $0x70] sm:$0xff] }
 0x288   : > { %v1078_v10 = vadd.f32 %v1386_v44, %v885_v2  ;;  %v1387_v6 = vpop.f32.mrb[4].mxu1 }
 0x289   : > { %v1388_v13 = vpop.f32.mrb[5].mxu1 }
 0x28a   : > { %1094 = vst [vmem:[#allocation2 + $0x8] sm:$0xff] %v1078_v10  ;;  %v1389_v15 = vadd.f32 %v1388_v13, %v1387_v6  ;;  %v899_v13 = vld [vmem:[#allocation2 + $0x78] sm:$0xff] }
 0x28c   : > { %v1079_v5 = vadd.f32 %v1389_v15, %v886_v11  ;;  %v1390_v17 = vpop.f32.mrb[6].mxu1 }
 0x28d   : > { %v1391_v8 = vpop.f32.mrb[7].mxu1 }
 0x28e   : > { %1095 = vst [vmem:[#allocation2 + $0x10] sm:$0xff] %v1079_v5  ;;  %v1392_v27 = vadd.f32 %v1391_v8, %v1390_v17  ;;  %v1339_v8 = vld [vmem:[%s2739_s18] ss:$0 sm:$0xff] (!%p1338_p2) }
 0x290   : > { %v1080_v35 = vadd.f32 %v1392_v27, %v887_v55  ;;  %v1393_v1 = vpop.f32.mrb[8].mxu1  ;;  %v1113_v55 = vld [vmem:[#allocation2] sm:$0xff] (!%p1338_p2) }
 0x291   : > { %v1394_v37 = vpop.f32.mrb[9].mxu1  ;;  %v1114_v27 = vld [vmem:[#allocation2 + $0x8] sm:$0xff] (!%p1338_p2) }
 0x292   : > { %1096 = vst [vmem:[#allocation2 + $0x18] sm:$0xff] %v1080_v35  ;;  %v1395_v21 = vadd.f32 %v1394_v37, %v1393_v1  ;;  %v1136_v35 = vadd.f32 (!%p1338_p2), %v1339_v8, %v1113_v55  ;;  %v1137_v1 = vadd.f32 (!%p1338_p2), %v1339_v8, %v1114_v27 }
 0x294   : > { %v1081_v56 = vadd.f32 %v1395_v21, %v888_v20  ;;  %1152 = vst [vmem:[%s2239_s9] sm:$0xff] (!%p1338_p2), %v1136_v35  ;;  %1153 = vst [vmem:[%s2239_s9 + $0x8] sm:$0xff] (!%p1338_p2), %v1137_v1 }
 0x295   : > { %v1115_v20 = vld [vmem:[#allocation2 + $0x10] sm:$0xff] (!%p1338_p2) }
 0x296   : > { %1097 = vst [vmem:[#allocation2 + $0x20] sm:$0xff] %v1081_v56  ;;  %v1396_v12 = vpop.f32.mrb[10].mxu1  ;;  %v1138_v56 = vadd.f32 (!%p1338_p2), %v1339_v8, %v1115_v20 }
 0x297   : > { %v1397_v36 = vpop.f32.mrb[11].mxu1 }
 0x298   : > { %v1398_v29 = vadd.f32 %v1397_v36, %v1396_v12  ;;  %1154 = vst [vmem:[%s2239_s9 + $0x10] sm:$0xff] (!%p1338_p2), %v1138_v56 }
 0x299   : > { %v1116_v37 = vld [vmem:[#allocation2 + $0x18] sm:$0xff] (!%p1338_p2) }
 0x29a   : > { %v1082_v43 = vadd.f32 %v1398_v29, %v889_v23  ;;  %v1139_v12 = vadd.f32 (!%p1338_p2), %v1339_v8, %v1116_v37 }
 0x29c   : > { %1098 = vst [vmem:[#allocation2 + $0x28] sm:$0xff] %v1082_v43  ;;  %1155 = vst [vmem:[%s2239_s9 + $0x18] sm:$0xff] (!%p1338_p2), %v1139_v12 }
 0x29d   : > { %v1399_v19 = vpop.f32.mrb[12].mxu1  ;;  %v1117_v21 = vld [vmem:[#allocation2 + $0x20] sm:$0xff] (!%p1338_p2) }
 0x29e   : > { %v1400_v25 = vpop.f32.mrb[13].mxu1  ;;  %v1140_v23 = vadd.f32 (!%p1338_p2), %v1339_v8, %v1117_v21 }
 0x29f   : > { %v1401_v61 = vadd.f32 %v1400_v25, %v1399_v19 }
 0x2a0   : > { %1156 = vst [vmem:[%s2239_s9 + $0x20] sm:$0xff] (!%p1338_p2), %v1140_v23 }
 0x2a1   : > { %v1083_v28 = vadd.f32 %v1401_v61, %v890_v3 }
 0x2a3   : > { %1099 = vst [vmem:[#allocation2 + $0x30] sm:$0xff] %v1083_v28  ;;  %v1402_v30 = vpop.f32.mrb[14].mxu1  ;;  %v1118_v36 = vld [vmem:[#allocation2 + $0x28] sm:$0xff] (!%p1338_p2) }
 0x2a4   : > { %v1403_v4 = vpop.f32.mrb[15].mxu1  ;;  %v1141_v19 = vadd.f32 (!%p1338_p2), %v1339_v8, %v1118_v36 }
 0x2a5   : > { %v1404_v32 = vadd.f32 %v1403_v4, %v1402_v30 }
 0x2a6   : > { %1157 = vst [vmem:[%s2239_s9 + $0x28] sm:$0xff] (!%p1338_p2), %v1141_v19 }
 0x2a7   : > { %v1084_v33 = vadd.f32 %v1404_v32, %v891_v31  ;;  %v1405_v60 = vpop.f32.mrb[16].mxu1 }
 0x2a8   : > { %v1406_v40 = vpop.f32.mrb[17].mxu1 }
 0x2a9   : > { %1100 = vst [vmem:[#allocation2 + $0x38] sm:$0xff] %v1084_v33  ;;  %v1407_v41 = vadd.f32 %v1406_v40, %v1405_v60 }
 0x2aa   : > { %v1119_v29 = vld [vmem:[#allocation2 + $0x30] sm:$0xff] (!%p1338_p2) }
 0x2ab   : > { %v1085_v42 = vadd.f32 %v1407_v41, %v892_v34  ;;  %v1142_v3 = vadd.f32 (!%p1338_p2), %v1339_v8, %v1119_v29 }
 0x2ac   : > { %v1408_v22 = vpop.f32.mrb[18].mxu1 }
 0x2ad   : > { %1101 = vst [vmem:[#allocation2 + $0x40] sm:$0xff] %v1085_v42  ;;  %v1409_v45 = vpop.f32.mrb[19].mxu1  ;;  %1158 = vst [vmem:[%s2239_s9 + $0x30] sm:$0xff] (!%p1338_p2), %v1142_v3 }
 0x2ae   : > { %v1410_v57 = vadd.f32 %v1409_v45, %v1408_v22 }
 0x2b0   : > { %v1086_v62 = vadd.f32 %v1410_v57, %v893_v50  ;;  %v1120_v43 = vld [vmem:[#allocation2 + $0x38] sm:$0xff] (!%p1338_p2) }
 0x2b1   : > { %v1143_v25 = vadd.f32 (!%p1338_p2), %v1339_v8, %v1120_v43 }
 0x2b2   : > { %1102 = vst [vmem:[#allocation2 + $0x48] sm:$0xff] %v1086_v62  ;;  %v1411_v46 = vpop.f32.mrb[20].mxu1 }
 0x2b3   : > { %v1412_v47 = vpop.f32.mrb[21].mxu1  ;;  %1159 = vst [vmem:[%s2239_s9 + $0x38] sm:$0xff] (!%p1338_p2), %v1143_v25 }
 0x2b4   : > { %v1413_v48 = vadd.f32 %v1412_v47, %v1411_v46  ;;  %v1121_v61 = vld [vmem:[#allocation2 + $0x40] sm:$0xff] (!%p1338_p2) }
 0x2b5   : > { %v1144_v31 = vadd.f32 (!%p1338_p2), %v1339_v8, %v1121_v61 }
 0x2b6   : > { %v1087_v49 = vadd.f32 %v1413_v48, %v894_v24  ;;  %v1414_v38 = vpop.f32.mrb[22].mxu1 }
 0x2b7   : > { %v1415_v52 = vpop.f32.mrb[23].mxu1  ;;  %1160 = vst [vmem:[%s2239_s9 + $0x40] sm:$0xff] (!%p1338_p2), %v1144_v31 }
 0x2b8   : > { %1103 = vst [vmem:[#allocation2 + $0x50] sm:$0xff] %v1087_v49  ;;  %v1416_v54 = vadd.f32 %v1415_v52, %v1414_v38 }
 0x2b9   : > { %v1122_v28 = vld [vmem:[#allocation2 + $0x48] sm:$0xff] (!%p1338_p2) }
 0x2ba   : > { %v1088_v58 = vadd.f32 %v1416_v54, %v895_v53  ;;  %v1417_v63 = vpop.f32.mrb[24].mxu1  ;;  %v1145_v4 = vadd.f32 (!%p1338_p2), %v1339_v8, %v1122_v28 }
 0x2bb   : > { %v1418_v51 = vpop.f32.mrb[25].mxu1 }
 0x2bc   : > { %1104 = vst [vmem:[#allocation2 + $0x58] sm:$0xff] %v1088_v58  ;;  %v1419_v0 = vadd.f32 %v1418_v51, %v1417_v63  ;;  %1161 = vst [vmem:[%s2239_s9 + $0x48] sm:$0xff] (!%p1338_p2), %v1145_v4 }
 0x2be   : > { %v1089_v18 = vadd.f32 %v1419_v0, %v896_v26  ;;  %v1420_v59 = vpop.f32.mrb[26].mxu1 }
 0x2bf   : > { %v1421_v14 = vpop.f32.mrb[27].mxu1  ;;  %v1123_v30 = vld [vmem:[#allocation2 + $0x50] sm:$0xff] (!%p1338_p2) }
 0x2c0   : > { %1105 = vst [vmem:[#allocation2 + $0x60] sm:$0xff] %v1089_v18  ;;  %v1422_v39 = vadd.f32 %v1421_v14, %v1420_v59  ;;  %v1146_v32 = vadd.f32 (!%p1338_p2), %v1339_v8, %v1123_v30 }
 0x2c2   : > { %v1090_v7 = vadd.f32 %v1422_v39, %v897_v16  ;;  %v1423_v2 = vpop.f32.mrb[28].mxu1  ;;  %1162 = vst [vmem:[%s2239_s9 + $0x50] sm:$0xff] (!%p1338_p2), %v1146_v32 }
 0x2c3   : > { %v1424_v44 = vpop.f32.mrb[29].mxu1  ;;  %v1124_v33 = vld [vmem:[#allocation2 + $0x58] sm:$0xff] (!%p1338_p2) }
 0x2c4   : > { %1106 = vst [vmem:[#allocation2 + $0x68] sm:$0xff] %v1090_v7  ;;  %v1425_v10 = vadd.f32 %v1424_v44, %v1423_v2  ;;  %v1147_v40 = vadd.f32 (!%p1338_p2), %v1339_v8, %v1124_v33 }
 0x2c6   : > { %v1091_v6 = vadd.f32 %v1425_v10, %v898_v9  ;;  %v1426_v11 = vpop.f32.mrb[30].mxu1  ;;  %1112 = sbr.rel (%p1338_p2) target bundleno = 727 (0x2d7), region = 60  ;;  %1163 = vst [vmem:[%s2239_s9 + $0x58] sm:$0xff] (!%p1338_p2), %v1147_v40 }
 0x2c7   : > { %v1427_v15 = vpop.f32.mrb[31].mxu1  ;;  %v1125_v60 = vld [vmem:[#allocation2 + $0x60] sm:$0xff] (!%p1338_p2) }
 0x2c8   : > { %1107 = vst [vmem:[#allocation2 + $0x70] sm:$0xff] %v1091_v6  ;;  %v1428_v5 = vadd.f32 %v1427_v15, %v1426_v11  ;;  %v1148_v41 = vadd.f32 (!%p1338_p2), %v1339_v8, %v1125_v60 }
 0x2ca   : > { %v1092_v17 = vadd.f32 %v1428_v5, %v899_v13  ;;  %1164 = vst [vmem:[%s2239_s9 + $0x60] sm:$0xff] (!%p1338_p2), %v1148_v41 }
 0x2cb   : > { %v1126_v34 = vld [vmem:[#allocation2 + $0x68] sm:$0xff] (!%p1338_p2) }
 0x2cc   : > { %1108 = vst [vmem:[#allocation2 + $0x78] sm:$0xff] %v1092_v17  ;;  %v1149_v42 = vadd.f32 (!%p1338_p2), %v1339_v8, %v1126_v34 }
 0x2ce   : > { %1165 = vst [vmem:[%s2239_s9 + $0x68] sm:$0xff] %v1149_v42 }
 0x2cf   : > { %v1127_v22 = vld [vmem:[#allocation2 + $0x70] sm:$0xff] }
 0x2d0   : > { %v1150_v45 = vadd.f32 %v1339_v8, %v1127_v22 }
 0x2d2   : > { %1166 = vst [vmem:[%s2239_s9 + $0x70] sm:$0xff] %v1150_v45 }
 0x2d3   : > { %v1128_v50 = vld [vmem:[#allocation2 + $0x78] sm:$0xff] }
 0x2d4   : > { %v1151_v57 = vadd.f32 %v1339_v8, %v1128_v50 }
 0x2d6   : > { %1167 = vst [vmem:[%s2239_s9 + $0x78] sm:$0xff] %v1151_v57 }
 0x2d7 PF: > { %s2740_s24 = sld [smem:[#allocation15_spill]]  ;;  %s1182_s8 = sshll.u32 %s2239_s9, 4  ;;  %s2628_s8 = int_to_ptr.vmem [resolvable:$true] %s1182_s8 }
 0x2d8   : > { %s2741_s7 = sld [smem:[#allocation23_spill]]  ;;  %s1169_s23 = scalar_lea.sflag [#allocation5], %s2212_s20 }
 0x2d9   : > { %s1768_s4 = scalar_lea.vmem %s2628_s8, 2048  ;;  %p2742_p11 = scmp.ne.s32.totalorder %s2729_s14, 0 }
 0x2da   : > { %p1769_p13 = scmp.ne.s32.totalorder %s2628_s8, %s1768_s4  ;;  %s1906_s15 = smov [#allocation9]  }
 0x2db   : > { %s1772_s30 = sshll.u32 %s1906_s15, 4  ;;  %s1773_s30 = int_to_ptr.vmem [resolvable:$false] %s1772_s30 }
 0x2dc   : > { %p1770_p6 = pnand %p1769_p13, %p2742_p11  ;;  %s1774_s13 = scalar_lea.vmem %s1773_s30, 4096 }
 0x2dd   : > { %s1348_s27 = sshll.u32 %s2740_s24, 11  ;;  %p1775_p1 = scmp.lt.s32.totalorder %s2628_s8, %s1773_s30 }
 0x2de   : > { %s2625_s6 = scalar_lea.hbm %s2741_s7, %s1348_s27  ;;  %p1771_p5 = pneg %p1770_p6 }
 0x2df   : > { %p1776_p0 = scmp.lt.s32.totalorder %s1774_s13, %s1768_s4 }
 0x2e1   : > { %p1777_p9 = por %p1776_p0, %p1775_p1 }
 0x2e3   : > { %p1778_p12 = pnand %p1777_p9, %p1771_p5 }
 0x2e5   : > { %1781 = shalt.err (!%p1778_p12)
}
 0x2e6   : > { %s1782_s12 = scalar_lea.hbm %s2625_s6, 2048  ;;  %s1786_s17 = scalar_lea.hbm %s2741_s7, 4096 }
 0x2e7   : > { %p1783_p3 = scmp.ne.s32.totalorder %s2625_s6, %s1782_s12  ;;  %p1787_p8 = scmp.lt.u32.totalorder %s2625_s6, %s2741_s7 }
 0x2e8   : > { %p1788_p10 = scmp.lt.u32.totalorder %s1786_s17, %s1782_s12  ;;  %p1790_p13 = scmp.lt.u32.totalorder %s1782_s12, %s2625_s6 }
 0x2e9   : > { %p1784_p4 = pnand %p1783_p3, %p2742_p11 }
 0x2ea   : > { %p1789_p2 = por %p1788_p10, %p1787_p8 }
 0x2eb   : > { %p1785_p7 = pneg %p1784_p4 }
 0x2ec   : > { %p1791_p6 = por %p1790_p13, %p1789_p2 }
 0x2ee   : > { %p1792_p5 = pnand %p1791_p6, %p1785_p7 }
 0x2f0   : > { %1795 = shalt.err (!%p1792_p5)
}
 0x2f1   : > { %s1907_s16 = smov 128   ;;  %s1908_s18 = smov 8  }
 0x2f2   : > { %1499 = dma.vmem_to_hbm [thread:$0]  (%p2742_p11), %s2628_s8, 2048, %s2625_s6, %s1169_s23, %s1907_s16, %s1907_s16, %s1908_s18  }
 0x2f3 PF: > { %p1516_p1 = scmp.ge.s32.totalorder %s1894_s28, 2  ;;  %s1197_s24 = sand.u32 1, %s1866_s21  }
 0x2f4   : > { %p2743_p0 = scmp.ne.s32.totalorder %s2731_s5, 0  ;;  %s1198_s27 = scalar_lea.sflag [#allocation5], %s1197_s24 }
 0x2f6   : > { %p1512_p9 = pnand %p1516_p1, %p2743_p0 }
 0x2f8   : > { %1849 = dma.done.wait (!%p1512_p9), %s1198_s27, 2048  }
 0x2f9   : > { %1851 = vsyncadd (!%p1512_p9), %s1198_s27, 4294965248  ;;  %s24_s28 = sadd.s32 1, %s1894_s28   ;;  %s2744_s11 = sld [smem:[#allocation13_spill]] }
 0x2fa   : > { %p21_p12 = scmp.ge.s32.totalorder %s24_s28, 6   ;;  %s2745_s20 = sld [smem:[#allocation18_spill]] }
 0x2fb   : > { %s2746_s14 = sld [smem:[#allocation14_spill]]  ;;  %s2747_s23 = sld [smem:[#allocation20_spill]] }
 0x2fc   : > { %s2748_s25 = sld [smem:[#allocation16_spill]]  ;;  %s2749_s29 = sld [smem:[#allocation17_spill]] }
 0x2fd   : > { %s2750_s27 = sld [smem:[#allocation19_spill]]  ;;  %s2751_s18 = smov %s1858_s19 }
 0x2fe   : > { %s2753_s21 = smov %s1870_s22  ;;  %s2755_s24 = smov %s1886_s26 }
 0x2ff   : > { %s2752_s19 = smov %s2744_s11  ;;  %23 = sbr.rel (!%p21_p12) target bundleno = 15 (0xf), region = 120 }
 0x301   : > { %s2754_s22 = smov %s2746_s14 }
 0x302   : > { %s2756_s26 = smov %s2749_s29 }
 0x306   :  { %1203 = vsyncpa [#allocation4], 1 }
 0x307   :  { %1205 = vsyncpa [#allocation4 + $0x1], 1 }
 0x308   :  { %1206 = vsyncpa [#allocation7], 1 }
 0x309   :  { %1208 = vsyncpa [#allocation7 + $0x1], 1 }
 0x30a   :  { %1209 = vsyncpa [#allocation5], 1 }
 0x30b   :  { %1211 = vsyncpa [#allocation5 + $0x1], 1 }

</bundles_post_ra>
